<compile_context>
chip_gen: v7x
topology: tpu7x:2x2x1
jax: 0.10.0
libtpu: 0.0.40
codegen_flags: <defaults>
</compile_context>

<pallas_src>
import functools

import jax
import jax.numpy as jnp
from jax.experimental import pallas as pl
from jax.experimental.pallas import tpu as pltpu

EPS = 1e-2            # pfrl EmpiricalNormalization default eps
OBS_CLIP = 5.0        # clip_threshold for obs normalizer (reward normalizer uses inf)


def _round_up(n, m):
    return ((n + m - 1) // m) * m


# --------------------------------------------------------------------------
# Kernels
# --------------------------------------------------------------------------
def _layer1_partial(x_ref, shift_ref, inv_ref, w1_ref):
    """Normalize one D-tile of x and multiply with the fused W1 tile (bf16 MXU)."""
    xn = jnp.clip(x_ref[...] * inv_ref[...] + shift_ref[...], -OBS_CLIP, OBS_CLIP)
    return jnp.dot(xn.astype(jnp.bfloat16), w1_ref[...].astype(jnp.bfloat16),
                   preferred_element_type=jnp.float32)


def _finalize(acc, s1_ref, b1_ref, w2_ref, s2_ref, b2_ref, rew_ref, out_ref, batch):
    """ReLU, fused layer 2 (pred - target), masked MSE, reward normalization."""
    h = jnp.maximum(acc * s1_ref[...] + b1_ref[...], 0.0)            # (B_pad, 2H) f32
    d = jnp.dot(h.astype(jnp.bfloat16), w2_ref[...].astype(jnp.bfloat16),
                preferred_element_type=jnp.float32)
    diff = d * s2_ref[...] + b2_ref[...]                              # (B_pad, F)
    sq = diff * diff
    if batch != diff.shape[0]:                                        # static branch
        rows = jax.lax.broadcasted_iota(jnp.int32, diff.shape, 0)
        sq = jnp.where(rows < batch, sq, 0.0)
    inv_n = 1.0 / float(batch * diff.shape[1])
    mse = jnp.sum(sq, axis=(0, 1), keepdims=True) * inv_n             # (1, 1)
    # reward normalization, folded to scale/shift at prep time (SMEM scalars)
    out_ref[...] = mse * rew_ref[0] + rew_ref[1]


def _rnd_kernel_single(x_ref, shift_ref, inv_ref, w1_ref, s1_ref, b1_ref,
                       w2_ref, s2_ref, b2_ref, rew_ref, out_ref, *, batch):
    """Whole forward pass in one grid step (no scratch, no pl.when)."""
    acc = _layer1_partial(x_ref, shift_ref, inv_ref, w1_ref)
    _finalize(acc, s1_ref, b1_ref, w2_ref, s2_ref, b2_ref, rew_ref, out_ref, batch)


def _rnd_kernel_multi(x_ref, shift_ref, inv_ref, w1_ref, s1_ref, b1_ref,
                      w2_ref, s2_ref, b2_ref, rew_ref, out_ref, acc_ref, *, batch):
    """D-tiled variant for very large obs dims (f32 accumulator in VMEM)."""
    k = pl.program_id(0)

    @pl.when(k == 0)
    def _():
        acc_ref[...] = jnp.zeros_like(acc_ref)

    acc_ref[...] += _layer1_partial(x_ref, shift_ref, inv_ref, w1_ref)

    @pl.when(k == pl.num_programs(0) - 1)
    def _():
        _finalize(acc_ref[...], s1_ref, b1_ref, w2_ref, s2_ref, b2_ref,
                  rew_ref, out_ref, batch)


# --------------------------------------------------------------------------
# One-time parameter fusion / compression (do NOT run per forward call)
# --------------------------------------------------------------------------
def _choose_tk(D, H2, F, w_bytes, b_pad_hint, budget_bytes):
    """Biggest D-tile that keeps the double-buffered working set under budget."""
    ALIGN = 512
    d_aligned = _round_up(D, ALIGN)
    # Constant-index blocks (double buffered) + f32 layer-1 accumulator.
    const = 2 * (H2 * F * w_bytes + (2 * H2 + 2 * F) * 4) + b_pad_hint * H2 * 4
    avail = max(budget_bytes - const, ALIGN * 8)
    # Per unit of tk: double-buffered x column (f32), W1 row, obs shift/inv rows.
    per_tk = 2 * (b_pad_hint * 4 + H2 * w_bytes + 8)
    tk = min(d_aligned, 4096, avail // per_tk)
    return max(ALIGN, (tk // ALIGN) * ALIGN)


def _quantize_cols_int8(w):
    """Symmetric per-output-column int8 quantization; returns (q_int8, scale_f32)."""
    amax = jnp.max(jnp.abs(w), axis=0, keepdims=True)
    scale = jnp.where(amax > 0.0, amax / 127.0, 1.0).astype(jnp.float32)
    q = jnp.clip(jnp.round(w / scale), -127.0, 127.0).astype(jnp.int8)
    return q, scale


def prepare_fused_params(params, *, weight_format="int8", tk=None,
                         batch_hint=8, vmem_budget_bytes=24 * 1024 * 1024):
    """Fuse target+predictor, fold normalizer constants, compress weights."""
    D, H = params["wt1"].shape
    F = params["wt2"].shape[1]
    H2 = 2 * H
    w_bytes = 1 if weight_format == "int8" else 2

    if tk is None:
        tk = _choose_tk(D, H2, F, w_bytes, _round_up(max(batch_hint, 8), 8),
                        vmem_budget_bytes)
    assert tk % 128 == 0, "tk must be a multiple of 128"
    D_pad = _round_up(D, tk)

    # Layer 1: W1 = [wt1 | wp1]  (D_pad, 2H), b1 = [bt1 | bp1]
    w1 = jnp.concatenate([params["wt1"], params["wp1"]], axis=1)
    if D_pad != D:
        w1 = jnp.pad(w1, ((0, D_pad - D), (0, 0)))
    b1 = jnp.concatenate([params["bt1"], params["bp1"]], axis=1)

    # Layer 2: diff = [ht | hp] @ [[-wt2], [wp2]] + (bp2 - bt2) = pred - target
    w2 = jnp.concatenate([-params["wt2"], params["wp2"]], axis=0)
    b2 = params["bp2"] - params["bt2"]

    if weight_format == "int8":
        w1, s1 = _quantize_cols_int8(w1)
        w2, s2 = _quantize_cols_int8(w2)
    else:  # "bf16"
        w1 = w1.astype(jnp.bfloat16)
        w2 = w2.astype(jnp.bfloat16)
        s1 = jnp.ones((1, H2), jnp.float32)
        s2 = jnp.ones((1, F), jnp.float32)
    # TODO(synk): on v7x an fp8 (e4m3) storage format would also feed the MXU
    # directly; int8-dequant-to-bf16 already halves HBM bytes on all chips.

    # Obs normalizer folded to a single multiply-add: xn = x*inv + shift
    inv = 1.0 / (params["obs_std"].astype(jnp.float32) + EPS)
    shift = -params["obs_mean"].astype(jnp.float32) * inv
    if D_pad != D:
        inv = jnp.pad(inv, ((0, 0), (0, D_pad - D)), constant_values=1.0)
        shift = jnp.pad(shift, ((0, 0), (0, D_pad - D)))

    # Reward normalizer folded to scale/shift SMEM scalars: r = mse*scale + shift
    rew_scale = 1.0 / (params["rew_std"].astype(jnp.float32) + EPS)
    rew_shift = -params["rew_mean"].astype(jnp.float32) * rew_scale
    rew = jnp.concatenate([rew_scale.reshape(1), rew_shift.reshape(1)]).astype(jnp.float32)

    return dict(w1=w1, s1=s1, b1=b1, w2=w2, s2=s2, b2=b2,
                obs_inv=inv, obs_shift=shift, rew=rew,
                D=D, D_pad=D_pad, tk=tk)


# --------------------------------------------------------------------------
# Forward wrapper
# --------------------------------------------------------------------------
def rnd_forward(x_nchw, fp):
    """Runs the RND forward pass. Returns intrinsic reward of shape (1,), float32."""
    B = x_nchw.shape[0]
    x_flat = x_nchw.reshape(B, -1).astype(jnp.float32)    # (B, D), torch.flatten order
    D, D_pad, tk = fp["D"], fp["D_pad"], fp["tk"]
    assert x_flat.shape[1] == D
    H2 = fp["w1"].shape[1]
    F = fp["w2"].shape[1]

    # Pad batch to a sublane multiple (padded rows are masked out of the MSE);
    # D padding only happens if D is not already tk-aligned.
    B_pad = _round_up(B, 8)
    pad_b, pad_d = B_pad - B, D_pad - D
    if pad_b or pad_d:
        x_flat = jnp.pad(x_flat, ((0, pad_b), (0, pad_d)))
    # TODO(synk): if raw observations are uint8 (Atari), pass them as uint8 and
    # cast inside the kernel to cut the input DMA by 4x.

    n_k = D_pad // tk
    if n_k == 1:
        kernel = functools.partial(_rnd_kernel_single, batch=B)
        scratch = []
    else:
        kernel = functools.partial(_rnd_kernel_multi, batch=B)
        scratch = [pltpu.VMEM((B_pad, H2), jnp.float32)]   # layer-1 f32 accumulator

    grid_spec = pltpu.PrefetchScalarGridSpec(
        num_scalar_prefetch=0,
        grid=(n_k,),
        in_specs=[
            pl.BlockSpec((B_pad, tk), lambda k: (0, k)),    # x tile (f32)
            pl.BlockSpec((1, tk),     lambda k: (0, k)),    # obs shift (-mean*inv)
            pl.BlockSpec((1, tk),     lambda k: (0, k)),    # obs inv_std
            pl.BlockSpec((tk, H2),    lambda k: (k, 0)),    # fused W1 tile (int8/bf16)
            pl.BlockSpec((1, H2),     lambda k: (0, 0)),    # W1 per-column scales
            pl.BlockSpec((1, H2),     lambda k: (0, 0)),    # fused b1
            pl.BlockSpec((H2, F),     lambda k: (0, 0)),    # fused W2 (int8/bf16)
            pl.BlockSpec((1, F),      lambda k: (0, 0)),    # W2 per-column scales
            pl.BlockSpec((1, F),      lambda k: (0, 0)),    # fused b2
            pl.BlockSpec(memory_space=pltpu.MemorySpace.SMEM),  # (rew_scale, rew_shift)
        ],
        out_specs=pl.BlockSpec((1, 1), lambda k: (0, 0)),
        scratch_shapes=scratch,
    )

    out = pl.pallas_call(
        kernel,
        out_shape=jax.ShapeDtypeStruct((1, 1), jnp.float32),
        grid_spec=grid_spec,
        compiler_params=pltpu.CompilerParams(
            # Single axis is the D reduction -> "arbitrary".
            # TODO(synk): for training-sized batches, add a leading "parallel"
            # batch-tile axis with per-tile partial sums so v7x's 2 TCs shard.
            dimension_semantics=("arbitrary",),
            # tk sizing budget is 24 MiB, so this is safe on v7x (64 MiB phys).
            vmem_limit_bytes=32 * 1024 * 1024,
        ),
    )(x_flat, fp["obs_shift"], fp["obs_inv"], fp["w1"], fp["s1"], fp["b1"],
      fp["w2"], fp["s2"], fp["b2"], fp["rew"])

    return out.reshape(1)                                  # matches intrinsic_reward.unsqueeze(0)


# --------------------------------------------------------------------------
# Parameter construction (mirrors RND.__init__: xavier-uniform MLPs, fresh normalizers)
# --------------------------------------------------------------------------
def _xavier_uniform(key, fan_in, fan_out):
    limit = (6.0 / (fan_in + fan_out)) ** 0.5
    return jax.random.uniform(key, (fan_in, fan_out), jnp.float32, -limit, limit)


def make_params(key, obs_dim, hidden, feat):
    keys = jax.random.split(key, 8)
    return {
        # obs normalizer initial state: mean=0, var=1 (pfrl EmpiricalNormalization init)
        "obs_mean": jnp.zeros((1, obs_dim), jnp.float32),
        "obs_std": jnp.ones((1, obs_dim), jnp.float32),
        # reward normalizer initial state
        "rew_mean": jnp.zeros((1, 1), jnp.float32),
        "rew_std": jnp.ones((1, 1), jnp.float32),
        # target network (xavier uniform weights, zero biases)
        "wt1": _xavier_uniform(keys[0], obs_dim, hidden),
        "bt1": jnp.zeros((1, hidden), jnp.float32),
        "wt2": _xavier_uniform(keys[1], hidden, feat),
        "bt2": jnp.zeros((1, feat), jnp.float32),
        # predictor network (independently re-initialized copy, as in RND.__init__)
        "wp1": _xavier_uniform(keys[2], obs_dim, hidden),
        "bp1": jnp.zeros((1, hidden), jnp.float32),
        "wp2": _xavier_uniform(keys[3], hidden, feat),
        "bp2": jnp.zeros((1, feat), jnp.float32),
    }


if __name__ == "__main__":
    # Small shapes: batch=2, channels=4, spatial=16x16 -> obs_dim=1024
    B, C, H, W = 2, 4, 16, 16
    HIDDEN, FEAT = 256, 128

    key = jax.random.PRNGKey(0)
    k_x, k_p = jax.random.split(key)
    x = jax.random.normal(k_x, (B, C, H, W), jnp.float32)   # NCHW, like PyTorch
    params = make_params(k_p, C * H * W, HIDDEN, FEAT)

    # Optimized config: int8-compressed fused weights, grid collapsed to (1,).
    fp_fast = prepare_fused_params(params, weight_format="int8")
    r_fast = rnd_forward(x, fp_fast)
    jax.block_until_ready(r_fast)

    # Cross-check config: bf16 weights, forced D tiling (tk=512 -> grid=(2,),
    # exercises the accumulating multi-step kernel path).
    fp_ref = prepare_fused_params(params, weight_format="bf16", tk=512)
    r_ref = rnd_forward(x, fp_ref)
    jax.block_until_ready(r_ref)

    assert r_fast.shape == (1,) and r_fast.dtype == jnp.float32
    assert bool(jnp.isfinite(r_fast[0])) and bool(jnp.isfinite(r_ref[0]))
    # int8 per-column quantization stays within a few percent of the bf16 path.
    rel = abs(float(r_fast[0]) - float(r_ref[0])) / max(abs(float(r_ref[0])), 1e-6)
    assert rel < 0.25, rel

    # TODO(synk): update_params=True branch (Adam step on predictor) and the
    # normalizers' running-statistics updates are training-time side effects,
    # not part of the returned forward value, so they are not implemented.

    print("KERNEL_OK")
</pallas_src>

<mosaic_0001>
module attributes {stable_mosaic.version = 11 : i64} {
  func.func @_rnd_kernel_single(%arg0: i32, %arg1: memref<8x1024xf32, #tpu.memory_space<vmem>>, %arg2: memref<1x1024xf32, #tpu.memory_space<vmem>>, %arg3: memref<1x1024xf32, #tpu.memory_space<vmem>>, %arg4: memref<1024x512xi8, #tpu.memory_space<vmem>>, %arg5: memref<1x512xf32, #tpu.memory_space<vmem>>, %arg6: memref<1x512xf32, #tpu.memory_space<vmem>>, %arg7: memref<512x128xi8, #tpu.memory_space<vmem>>, %arg8: memref<1x128xf32, #tpu.memory_space<vmem>>, %arg9: memref<1x128xf32, #tpu.memory_space<vmem>>, %arg10: memref<2xf32, #tpu.memory_space<smem>>, %arg11: memref<1x1xf32, #tpu.memory_space<vmem>>) attributes {dimension_semantics = [#tpu.dimension_semantics<arbitrary>], iteration_bounds = array<i64: 1>, scalar_prefetch = 0 : i64, scratch_operands = 0 : i64, tpu.core_type = #tpu.core_type<tc>, window_params = [{transform_indices = @transform_0, window_bounds = array<i64: 8, 1024>}, {transform_indices = @transform_1, window_bounds = array<i64: 1, 1024>}, {transform_indices = @transform_2, window_bounds = array<i64: 1, 1024>}, {transform_indices = @transform_3, window_bounds = array<i64: 1024, 512>}, {pipeline_mode = #tpu.pipeline_mode<synchronous>, transform_indices = @transform_4, window_bounds = array<i64: 1, 512>}, {pipeline_mode = #tpu.pipeline_mode<synchronous>, transform_indices = @transform_5, window_bounds = array<i64: 1, 512>}, {pipeline_mode = #tpu.pipeline_mode<synchronous>, transform_indices = @transform_6, window_bounds = array<i64: 512, 128>}, {pipeline_mode = #tpu.pipeline_mode<synchronous>, transform_indices = @transform_7, window_bounds = array<i64: 1, 128>}, {pipeline_mode = #tpu.pipeline_mode<synchronous>, transform_indices = @transform_8, window_bounds = array<i64: 1, 128>}, {transform_indices = @transform_9, window_bounds = array<i64: 2>}, {pipeline_mode = #tpu.pipeline_mode<synchronous>, transform_indices = @transform_10, window_bounds = array<i64: 1, 1>}]} {
    %c0 = arith.constant 0 : index
    %c0_0 = arith.constant 0 : index
    %0 = vector.load %arg1[%c0, %c0_0] : memref<8x1024xf32, #tpu.memory_space<vmem>>, vector<8x1024xf32>
    %c0_1 = arith.constant 0 : index
    %c0_2 = arith.constant 0 : index
    %1 = vector.load %arg3[%c0_1, %c0_2] : memref<1x1024xf32, #tpu.memory_space<vmem>>, vector<1x1024xf32>
    %2 = vector.broadcast %1 : vector<1x1024xf32> to vector<8x1024xf32>
    %3 = arith.mulf %0, %2 : vector<8x1024xf32>
    %c0_3 = arith.constant 0 : index
    %c0_4 = arith.constant 0 : index
    %4 = vector.load %arg2[%c0_3, %c0_4] : memref<1x1024xf32, #tpu.memory_space<vmem>>, vector<1x1024xf32>
    %5 = vector.broadcast %4 : vector<1x1024xf32> to vector<8x1024xf32>
    %6 = arith.addf %3, %5 : vector<8x1024xf32>
    %cst = arith.constant -5.000000e+00 : f32
    %cst_5 = arith.constant 5.000000e+00 : f32
    %7 = vector.broadcast %cst : f32 to vector<8x1024xf32>
    %8 = arith.maximumf %7, %6 : vector<8x1024xf32>
    %9 = vector.broadcast %cst_5 : f32 to vector<8x1024xf32>
    %10 = arith.minimumf %9, %8 : vector<8x1024xf32>
    %11 = arith.truncf %10 : vector<8x1024xf32> to vector<8x1024xbf16>
    %c0_6 = arith.constant 0 : index
    %c0_7 = arith.constant 0 : index
    %12 = vector.load %arg4[%c0_6, %c0_7] : memref<1024x512xi8, #tpu.memory_space<vmem>>, vector<1024x512xi8>
    %13 = arith.sitofp %12 : vector<1024x512xi8> to vector<1024x512xbf16>
    %cst_8 = arith.constant dense<0.000000e+00> : vector<8x512xf32>
    %14 = tpu.matmul %11, %13, %cst_8 {dimension_numbers = #tpu.dot_dimension_numbers<[1], [0], [0], [1], [0, 0, 1, 1], [], []>} : vector<8x1024xbf16>, vector<1024x512xbf16>, vector<8x512xf32> -> vector<8x512xf32>
    %c0_9 = arith.constant 0 : index
    %c0_10 = arith.constant 0 : index
    %15 = vector.load %arg5[%c0_9, %c0_10] : memref<1x512xf32, #tpu.memory_space<vmem>>, vector<1x512xf32>
    %16 = vector.broadcast %15 : vector<1x512xf32> to vector<8x512xf32>
    %17 = arith.mulf %14, %16 : vector<8x512xf32>
    %c0_11 = arith.constant 0 : index
    %c0_12 = arith.constant 0 : index
    %18 = vector.load %arg6[%c0_11, %c0_12] : memref<1x512xf32, #tpu.memory_space<vmem>>, vector<1x512xf32>
    %19 = vector.broadcast %18 : vector<1x512xf32> to vector<8x512xf32>
    %20 = arith.addf %17, %19 : vector<8x512xf32>
    %cst_13 = arith.constant 0.000000e+00 : f32
    %21 = vector.broadcast %cst_13 : f32 to vector<8x512xf32>
    %22 = arith.maximumf %20, %21 : vector<8x512xf32>
    %23 = arith.truncf %22 : vector<8x512xf32> to vector<8x512xbf16>
    %c0_14 = arith.constant 0 : index
    %c0_15 = arith.constant 0 : index
    %24 = vector.load %arg7[%c0_14, %c0_15] : memref<512x128xi8, #tpu.memory_space<vmem>>, vector<512x128xi8>
    %25 = arith.sitofp %24 : vector<512x128xi8> to vector<512x128xbf16>
    %cst_16 = arith.constant dense<0.000000e+00> : vector<8x128xf32>
    %26 = tpu.matmul %23, %25, %cst_16 {dimension_numbers = #tpu.dot_dimension_numbers<[1], [0], [0], [1], [0, 0, 1, 1], [], []>} : vector<8x512xbf16>, vector<512x128xbf16>, vector<8x128xf32> -> vector<8x128xf32>
    %c0_17 = arith.constant 0 : index
    %c0_18 = arith.constant 0 : index
    %27 = vector.load %arg8[%c0_17, %c0_18] : memref<1x128xf32, #tpu.memory_space<vmem>>, vector<1x128xf32>
    %28 = vector.broadcast %27 : vector<1x128xf32> to vector<8x128xf32>
    %29 = arith.mulf %26, %28 : vector<8x128xf32>
    %c0_19 = arith.constant 0 : index
    %c0_20 = arith.constant 0 : index
    %30 = vector.load %arg9[%c0_19, %c0_20] : memref<1x128xf32, #tpu.memory_space<vmem>>, vector<1x128xf32>
    %31 = vector.broadcast %30 : vector<1x128xf32> to vector<8x128xf32>
    %32 = arith.addf %29, %31 : vector<8x128xf32>
    %33 = arith.mulf %32, %32 : vector<8x128xf32>
    %34 = tpu.iota {dimensions = array<i32: 0>} : vector<8x128xi32>
    %c2_i32 = arith.constant 2 : i32
    %35 = vector.broadcast %c2_i32 : i32 to vector<8x128xi32>
    %36 = arith.cmpi slt, %34, %35 : vector<8x128xi32>
    %cst_21 = arith.constant 0.000000e+00 : f32
    %37 = vector.broadcast %cst_21 : f32 to vector<8x128xf32>
    %38 = arith.select %36, %33, %37 : vector<8x128xi1>, vector<8x128xf32>
    %39 = vector.shape_cast %38 : vector<8x128xf32> to vector<1x8x128xf32>
    %cst_22 = arith.constant dense<0.000000e+00> : vector<1xf32>
    %40 = vector.multi_reduction <add>, %39, %cst_22 [1, 2] : vector<1x8x128xf32> to vector<1xf32>
    %41 = vector.shape_cast %40 : vector<1xf32> to vector<1x1x1xf32>
    %42 = vector.extract %41[0, 0, 0] : f32 from vector<1x1x1xf32>
    %43 = vector.broadcast %42 : f32 to vector<1x1xf32>
    %cst_23 = arith.constant 3.906250e-03 : f32
    %44 = vector.broadcast %cst_23 : f32 to vector<1x1xf32>
    %45 = arith.mulf %43, %44 : vector<1x1xf32>
    %c0_24 = arith.constant 0 : index
    %46 = memref.load %arg10[%c0_24] : memref<2xf32, #tpu.memory_space<smem>>
    %47 = vector.broadcast %46 : f32 to vector<1x1xf32>
    %48 = arith.mulf %45, %47 : vector<1x1xf32>
    %c1 = arith.constant 1 : index
    %49 = memref.load %arg10[%c1] : memref<2xf32, #tpu.memory_space<smem>>
    %50 = vector.broadcast %49 : f32 to vector<1x1xf32>
    %51 = arith.addf %48, %50 : vector<1x1xf32>
    %c0_25 = arith.constant 0 : index
    %c0_26 = arith.constant 0 : index
    %52 = vector.load %arg11[%c0_25, %c0_26] : memref<1x1xf32, #tpu.memory_space<vmem>>, vector<1x1xf32>
    tpu.vector_store %arg11[%c0_25, %c0_26], %51 {strides = array<i32>} : memref<1x1xf32, #tpu.memory_space<vmem>>, vector<1x1xf32>,
    return
  }
  func.func @transform_0(%arg0: i32) -> (i32, i32) {
    %c0_i32 = arith.constant 0 : i32
    %c0_i32_0 = arith.constant 0 : i32
    return %c0_i32, %arg0 : i32, i32
  }
  func.func @transform_1(%arg0: i32) -> (i32, i32) {
    %c0_i32 = arith.constant 0 : i32
    %c0_i32_0 = arith.constant 0 : i32
    return %c0_i32, %arg0 : i32, i32
  }
  func.func @transform_2(%arg0: i32) -> (i32, i32) {
    %c0_i32 = arith.constant 0 : i32
    %c0_i32_0 = arith.constant 0 : i32
    return %c0_i32, %arg0 : i32, i32
  }
  func.func @transform_3(%arg0: i32) -> (i32, i32) {
    %c0_i32 = arith.constant 0 : i32
    %c0_i32_0 = arith.constant 0 : i32
    return %arg0, %c0_i32 : i32, i32
  }
  func.func @transform_4(%arg0: i32) -> (i32, i32) {
    %c0_i32 = arith.constant 0 : i32
    %c0_i32_0 = arith.constant 0 : i32
    %c0_i32_1 = arith.constant 0 : i32
    return %c0_i32, %c0_i32_0 : i32, i32
  }
  func.func @transform_5(%arg0: i32) -> (i32, i32) {
    %c0_i32 = arith.constant 0 : i32
    %c0_i32_0 = arith.constant 0 : i32
    %c0_i32_1 = arith.constant 0 : i32
    return %c0_i32, %c0_i32_0 : i32, i32
  }
  func.func @transform_6(%arg0: i32) -> (i32, i32) {
    %c0_i32 = arith.constant 0 : i32
    %c0_i32_0 = arith.constant 0 : i32
    %c0_i32_1 = arith.constant 0 : i32
    return %c0_i32, %c0_i32_0 : i32, i32
  }
  func.func @transform_7(%arg0: i32) -> (i32, i32) {
    %c0_i32 = arith.constant 0 : i32
    %c0_i32_0 = arith.constant 0 : i32
    %c0_i32_1 = arith.constant 0 : i32
    return %c0_i32, %c0_i32_0 : i32, i32
  }
  func.func @transform_8(%arg0: i32) -> (i32, i32) {
    %c0_i32 = arith.constant 0 : i32
    %c0_i32_0 = arith.constant 0 : i32
    %c0_i32_1 = arith.constant 0 : i32
    return %c0_i32, %c0_i32_0 : i32, i32
  }
  func.func @transform_9(%arg0: i32) -> i32 {
    %c0_i32 = arith.constant 0 : i32
    %c0_i32_0 = arith.constant 0 : i32
    return %c0_i32 : i32
  }
  func.func @transform_10(%arg0: i32) -> (i32, i32) {
    %c0_i32 = arith.constant 0 : i32
    %c0_i32_0 = arith.constant 0 : i32
    %c0_i32_1 = arith.constant 0 : i32
    return %c0_i32, %c0_i32_0 : i32, i32
  }
}

</mosaic_0001>

<bundles_post_ra>
// kernel: tpu_custom_call.1
= control target key start
LH: loop header
LB: loop body
LE: loop exit
PB: predicated region body
PF: predicated region fallthrough
CT: control target
= control target key end

     0   :  { %15 = vsyncpa [#allocation3], 0  ;;  %s1663_s0 = inlined_call_operand.hbm [shape: f32[8,1024], index: 0, kind: input, shape index: {}]   ;;  %s1664_s1 = inlined_call_operand.hbm [shape: f32[1,1024], index: 1, kind: input, shape index: {}]   ;;  %s1665_s2 = inlined_call_operand.hbm [shape: f32[1,1024], index: 2, kind: input, shape index: {}]   ;;  %s1666_s3 = inlined_call_operand.hbm [shape: s8[1024,512], index: 3, kind: input, shape index: {}]   ;;  %s1667_s4 = inlined_call_operand.vmem [shape: f32[1,512], index: 4, kind: input, shape index: {}]   ;;  %s1668_s5 = inlined_call_operand.vmem [shape: f32[1,512], index: 5, kind: input, shape index: {}]   ;;  %s1669_s6 = inlined_call_operand.hbm [shape: s8[512,128], index: 6, kind: input, shape index: {}]   ;;  %s1670_s7 = inlined_call_operand.vmem [shape: f32[1,128], index: 7, kind: input, shape index: {}]   ;;  %s1671_s8 = inlined_call_operand.vmem [shape: f32[1,128], index: 8, kind: input, shape index: {}]   ;;  %s1672_s9 = inlined_call_operand.vmem [shape: f32[2], index: 9, kind: input, shape index: {}]   ;;  %s1673_s10 = inlined_call_operand.hbm [shape: f32[1,1], index: 10, kind: output, shape index: {}]  }
   0x1   :  { %16 = vsyncpa [#allocation7], 0 }
   0x2   :  { %17 = vsyncpa [#allocation10], 0 }
   0x3   :  { %18 = vsyncpa [#allocation5], 0 }
   0x4   :  { %19 = vsyncpa [#allocation4], 0  ;;  %s1450_s13 = smov [#allocation6]   ;;  %s1451_s15 = smov [#allocation9]  }
   0x5   :  { %s36_s14 = sshll.u32 %s1450_s13, 4  ;;  %s55_s16 = sshll.u32 %s1451_s15, 4  ;;  %s37_s14 = int_to_ptr.vmem [resolvable:$true] %s36_s14  ;;  %s1516_s16 = int_to_ptr.vmem [resolvable:$true] %s55_s16 }
   0x6   :  { %s1296_s19 = scalar_lea.hbm %s1664_s1, 128 }
   0x7   :  { %p1297_p0 = scmp.ne.s32.totalorder %s1664_s1, %s1296_s19  ;;  %p1300_p1 = scmp.lt.u32.totalorder %s1296_s19, %s1664_s1 }
   0x9   :  { %p1302_p2 = pnand %p1300_p1, %p1297_p0 }
   0xb   :  { %1305 = shalt.err (!%p1302_p2)
}
   0xc   :  { %s1306_s24 = scalar_lea.vmem %s37_s14, 128  ;;  %p1311_p4 = scmp.lt.s32.totalorder %s37_s14, %s37_s14 }
   0xd   :  { %p1307_p3 = scmp.ne.s32.totalorder %s37_s14, %s1306_s24  ;;  %p1312_p5 = scmp.lt.s32.totalorder %s1306_s24, %s1306_s24 }
   0xf   :  { %p1313_p6 = por %p1312_p5, %p1311_p4 }
  0x11   :  { %p1314_p7 = pnand %p1313_p6, %p1307_p3 }
  0x13   :  { %1317 = shalt.err (!%p1314_p7)
}
  0x14   :  { %39 = dma.hbm_to_vmem [thread:$0]  %s1664_s1, 128, %s37_s14, [#allocation7]  }
  0x15   :  { %s1318_s29 = scalar_lea.hbm %s1666_s3, 16384 }
  0x16   :  { %p1319_p8 = scmp.ne.s32.totalorder %s1666_s3, %s1318_s29  ;;  %p1322_p9 = scmp.lt.u32.totalorder %s1318_s29, %s1666_s3 }
  0x18   :  { %p1324_p10 = pnand %p1322_p9, %p1319_p8 }
  0x1a   :  { %1327 = shalt.err (!%p1324_p10)
}
  0x1b   :  { %s1328_s15 = scalar_lea.vmem %s1516_s16, 16384  ;;  %p1333_p12 = scmp.lt.s32.totalorder %s1516_s16, %s1516_s16 }
  0x1c   :  { %p1329_p11 = scmp.ne.s32.totalorder %s1516_s16, %s1328_s15  ;;  %p1334_p13 = scmp.lt.s32.totalorder %s1328_s15, %s1328_s15 }
  0x1e   :  { %p1335_p0 = por %p1334_p13, %p1333_p12 }
  0x20   :  { %p1336_p1 = pnand %p1335_p0, %p1329_p11 }
  0x22   :  { %1339 = shalt.err (!%p1336_p1)
}
  0x23   :  { %s1452_s1 = smov 512   ;;  %s1453_s14 = smov 32  }
  0x24   :  { %61 = dma.hbm_to_vmem [thread:$0]  %s1666_s3, 16384, %s1516_s16, [#allocation10], %s1452_s1, %s1452_s1, %s1453_s14  }
  0x25   :  { %s1454_s19 = smov [#allocation2]   ;;  %s1455_s21 = smov [#allocation8]  }
  0x26   :  { %s26_s20 = sshll.u32 %s1454_s19, 4  ;;  %s46_s22 = sshll.u32 %s1455_s21, 4  ;;  %s27_s20 = int_to_ptr.vmem [resolvable:$true] %s26_s20  ;;  %s47_s22 = int_to_ptr.vmem [resolvable:$true] %s46_s22 }
  0x27   :  { %s1340_s25 = scalar_lea.hbm %s1663_s0, 1024 }
  0x28   :  { %p1341_p2 = scmp.ne.s32.totalorder %s1663_s0, %s1340_s25  ;;  %p1344_p3 = scmp.lt.u32.totalorder %s1340_s25, %s1663_s0 }
  0x2a   :  { %p1346_p4 = pnand %p1344_p3, %p1341_p2 }
  0x2c   :  { %1349 = shalt.err (!%p1346_p4)
}
  0x2d   :  { %s1350_s3 = scalar_lea.vmem %s27_s20, 1024  ;;  %p1355_p6 = scmp.lt.s32.totalorder %s27_s20, %s27_s20 }
  0x2e   :  { %p1351_p5 = scmp.ne.s32.totalorder %s27_s20, %s1350_s3  ;;  %p1356_p7 = scmp.lt.s32.totalorder %s1350_s3, %s1350_s3 }
  0x30   :  { %p1357_p8 = por %p1356_p7, %p1355_p6 }
  0x32   :  { %p1358_p9 = pnand %p1357_p8, %p1351_p5 }
  0x34   :  { %1361 = shalt.err (!%p1358_p9)
}
  0x35   :  { %29 = dma.hbm_to_vmem [thread:$0]  %s1663_s0, 1024, %s27_s20, [#allocation3]  }
  0x36   :  { %s1362_s13 = scalar_lea.hbm %s1665_s2, 128 }
  0x37   :  { %p1363_p10 = scmp.ne.s32.totalorder %s1665_s2, %s1362_s13  ;;  %p1366_p11 = scmp.lt.u32.totalorder %s1362_s13, %s1665_s2 }
  0x39   :  { %p1368_p12 = pnand %p1366_p11, %p1363_p10 }
  0x3b   :  { %1371 = shalt.err (!%p1368_p12)
}
  0x3c   :  { %s1372_s18 = scalar_lea.vmem %s47_s22, 128  ;;  %p1377_p0 = scmp.lt.s32.totalorder %s47_s22, %s47_s22 }
  0x3d   :  { %p1373_p13 = scmp.ne.s32.totalorder %s47_s22, %s1372_s18  ;;  %p1378_p1 = scmp.lt.s32.totalorder %s1372_s18, %s1372_s18 }
  0x3f   :  { %p1379_p2 = por %p1378_p1, %p1377_p0 }
  0x41   :  { %p1380_p3 = pnand %p1379_p2, %p1373_p13 }
  0x43   :  { %1383 = shalt.err (!%p1380_p3)
}
  0x44   :  { %49 = dma.hbm_to_vmem [thread:$0]  %s1665_s2, 128, %s47_s22, [#allocation7]  }
  0x45   :  { %s1456_s20 = smov [#allocation11]   ;;  %s88_s25 = sshll.u32 %s1672_s9, 4  ;;  %s89_s25 = int_to_ptr.vmem [resolvable:$true] %s88_s25 }
  0x46   :  { %s71_s21 = sshll.u32 %s1456_s20, 4  ;;  %s1384_s28 = scalar_lea.hbm %s1669_s6, 2048  ;;  %s72_s21 = int_to_ptr.vmem [resolvable:$true] %s71_s21 }
  0x47   :  { %p1385_p4 = scmp.ne.s32.totalorder %s1669_s6, %s1384_s28  ;;  %p1388_p5 = scmp.lt.u32.totalorder %s1384_s28, %s1669_s6 }
  0x49   :  { %p1390_p6 = pnand %p1388_p5, %p1385_p4 }
  0x4b   :  { %1393 = shalt.err (!%p1390_p6)
}
  0x4c   :  { %s1394_s2 = scalar_lea.vmem %s72_s21, 2048  ;;  %p1399_p8 = scmp.lt.s32.totalorder %s72_s21, %s72_s21 }
  0x4d   :  { %p1395_p7 = scmp.ne.s32.totalorder %s72_s21, %s1394_s2  ;;  %p1400_p9 = scmp.lt.s32.totalorder %s1394_s2, %s1394_s2 }
  0x4f   :  { %p1401_p10 = por %p1400_p9, %p1399_p8 }
  0x51   :  { %p1402_p11 = pnand %p1401_p10, %p1395_p7 }
  0x53   :  { %1405 = shalt.err (!%p1402_p11)
}
  0x54   :  { %s1457_s9 = smov 128   ;;  %s1458_s22 = smov 8  }
  0x55   :  { %77 = dma.hbm_to_vmem [thread:$0]  %s1669_s6, 2048, %s72_s21, [#allocation10], %s1457_s9, %s1457_s9, %s1458_s22  }
  0x56   :  { %s1406_s13 = scalar_lea.vmem %s89_s25, 16  ;;  %p1411_p13 = scmp.lt.s32.totalorder %s89_s25, %s89_s25 }
  0x57   :  { %p1407_p12 = scmp.ne.s32.totalorder %s89_s25, %s1406_s13  ;;  %p1412_p0 = scmp.lt.s32.totalorder %s1406_s13, %s1406_s13 }
  0x59   :  { %p1413_p1 = por %p1412_p0, %p1411_p13 }
  0x5b   :  { %p1414_p2 = pnand %p1413_p1, %p1407_p12 }
  0x5d   :  { %1417 = shalt.err (!%p1414_p2)
}
  0x5e   :  { %s1459_s15 = smov [#allocation12]  }
  0x5f   :  { %91 = dma.vmem_to_smem %s89_s25, 16, %s1459_s15, [#allocation5]  }
  0x60   :  { %1440 = dma.done.wait [#allocation3], 1024  }
  0x61   :  { %1441 = vsyncadd [#allocation3], 4294966272 }
  0x62   :  { %1442 = dma.done.wait [#allocation7], 256  }
  0x63   :  { %1443 = vsyncadd [#allocation7], 4294967040 }
  0x64   :  { %1444 = dma.done.wait [#allocation10], 18432  }
  0x65   :  { %1445 = vsyncadd [#allocation10], 4294948864 }
  0x66   :  { %1446 = dma.done.wait [#allocation5], 16  }
  0x67   :  { %1447 = vsyncadd [#allocation5], 4294967280 }
  0x68   :  { %110 = sfence }
  0x69   :  { %v245_v0 = vld [vmem:[#allocation9 + $0x8] sm:$0xff]  ;;  %v247_v1 = vld [vmem:[#allocation9 + $0x18] sm:$0xff]  ;;  %v244_v2 = vld [vmem:[#allocation9] sm:$0xff]  ;;  %v122_v30 = vlaneseq  ;;  %s1212_s19 = sld [smem:[#allocation12 + $0x1]]  ;;  %vm1182_vm1 = vcmask 0  }
  0x6a   :  { %v373_v3 = vunpack.c.l.s8.bf16 %v245_v0  ;;  %v377_v4 = vunpack.c.h.s8.bf16 %v245_v0  ;;  %v375_v5 = vunpack.c.l.s8.bf16 %v247_v1  ;;  %v379_v6 = vunpack.c.h.s8.bf16 %v247_v1  ;;  %v246_v7 = vld [vmem:[#allocation9 + $0x10] sm:$0xff]  ;;  %v249_v10 = vld [vmem:[#allocation9 + $0x28] sm:$0xff]  ;;  %v251_v11 = vld [vmem:[#allocation9 + $0x38] sm:$0xff] }
  0x6b   :  { %v372_v8 = vunpack.c.l.s8.bf16 %v244_v2  ;;  %v374_v9 = vunpack.c.l.s8.bf16 %v246_v7  ;;  %v376_v12 = vunpack.c.h.s8.bf16 %v244_v2  ;;  %v378_v13 = vunpack.c.h.s8.bf16 %v246_v7  ;;  %v248_v16 = vld [vmem:[#allocation9 + $0x20] sm:$0xff]  ;;  %v250_v17 = vld [vmem:[#allocation9 + $0x30] sm:$0xff]  ;;  %v253_v22 = vld [vmem:[#allocation9 + $0x48] sm:$0xff] }
  0x6c   :  { %628 = vmatprep.subr.bf16.mxu0 %v373_v3  ;;  %792 = vmatprep.subr.bf16.mxu1 %v375_v5  ;;  %v381_v14 = vunpack.c.l.s8.bf16 %v249_v10  ;;  %v383_v15 = vunpack.c.l.s8.bf16 %v251_v11  ;;  %v380_v18 = vunpack.c.l.s8.bf16 %v248_v16  ;;  %v382_v19 = vunpack.c.l.s8.bf16 %v250_v17  ;;  %v255_v23 = vld [vmem:[#allocation9 + $0x58] sm:$0xff]  ;;  %v252_v28 = vld [vmem:[#allocation9 + $0x40] sm:$0xff]  ;;  %v254_v29 = vld [vmem:[#allocation9 + $0x50] sm:$0xff] }
  0x6d   :  { %629 = vmatpush1.bf16.msra.mxu0 %v372_v8  ;;  %793 = vmatpush1.bf16.msra.mxu1 %v374_v9  ;;  %v385_v20 = vunpack.c.h.s8.bf16 %v249_v10  ;;  %v387_v21 = vunpack.c.h.s8.bf16 %v251_v11  ;;  %v384_v24 = vunpack.c.h.s8.bf16 %v248_v16  ;;  %v386_v25 = vunpack.c.h.s8.bf16 %v250_v17  ;;  %v257_v35 = vld [vmem:[#allocation9 + $0x68] sm:$0xff]  ;;  %v259_v37 = vld [vmem:[#allocation9 + $0x78] sm:$0xff]  ;;  %v1590_v39 = vld [vmem:[#allocation6] sm:$0xff] }
  0x6e   :  { %630 = vmatprep.subr.bf16.mxu0 %v377_v4  ;;  %794 = vmatprep.subr.bf16.mxu1 %v379_v6  ;;  %v389_v26 = vunpack.c.l.s8.bf16 %v253_v22  ;;  %v391_v27 = vunpack.c.l.s8.bf16 %v255_v23  ;;  %v388_v31 = vunpack.c.l.s8.bf16 %v252_v28  ;;  %v390_v32 = vunpack.c.l.s8.bf16 %v254_v29  ;;  %v1588_v38 = vld [vmem:[#allocation8] sm:$0xff]  ;;  %v256_v46 = vld [vmem:[#allocation9 + $0x60] sm:$0xff]  ;;  %v258_v47 = vld [vmem:[#allocation9 + $0x70] sm:$0xff] }
  0x6f   :  { %v393_v33 = vunpack.c.h.s8.bf16 %v253_v22  ;;  %v395_v34 = vunpack.c.h.s8.bf16 %v255_v23  ;;  %v1586_v36 = vshrl.u32 %v122_v30, 7  ;;  %v392_v41 = vunpack.c.h.s8.bf16 %v252_v28  ;;  %v113_v43 = vld [vmem:[#allocation2 + $0x8] sm:$0xff]  ;;  %v261_v56 = vld [vmem:[#allocation9 + $0x88] sm:$0xff]  ;;  %v260_v63 = vld [vmem:[#allocation9 + $0x80] sm:$0xff] }
  0x70   :  { %v394_v42 = vunpack.c.h.s8.bf16 %v254_v29  ;;  %v397_v44 = vunpack.c.l.s8.bf16 %v257_v35  ;;  %v399_v45 = vunpack.c.l.s8.bf16 %v259_v37  ;;  %v396_v51 = vunpack.c.l.s8.bf16 %v256_v46  ;;  %v263_v57 = vld [vmem:[#allocation9 + $0x98] sm:$0xff]  ;;  %v262_v0 = vld [vmem:[#allocation9 + $0x90] sm:$0xff]  ;;  %v265_v6 = vld [vmem:[#allocation9 + $0xa8] sm:$0xff] }
  0x71   :  { %631 = vmatpush1.bf16.msra.mxu0 %v376_v12  ;;  %795 = vmatpush1.bf16.msra.mxu1 %v378_v13  ;;  %v1593_v40 = vsub.s32 1, %v1586_v36  ;;  %v398_v52 = vunpack.c.l.s8.bf16 %v258_v47  ;;  %v401_v53 = vunpack.c.h.s8.bf16 %v257_v35  ;;  %v403_v54 = vunpack.c.h.s8.bf16 %v259_v37  ;;  %v267_v7 = vld [vmem:[#allocation9 + $0xb8] sm:$0xff]  ;;  %v264_v12 = vld [vmem:[#allocation9 + $0xa0] sm:$0xff]  ;;  %v266_v13 = vld [vmem:[#allocation9 + $0xb0] sm:$0xff] }
  0x72   :  { %632 = vmatprep.subr.bf16.mxu0 %v381_v14  ;;  %796 = vmatprep.subr.bf16.mxu1 %v383_v15  ;;  %v400_v59 = vunpack.c.h.s8.bf16 %v256_v46  ;;  %v402_v60 = vunpack.c.h.s8.bf16 %v258_v47  ;;  %v405_v61 = vunpack.c.l.s8.bf16 %v261_v56  ;;  %v407_v62 = vunpack.c.l.s8.bf16 %v263_v57  ;;  %v275_v35 = vld [vmem:[#allocation9 + $0xf8] sm:$0xff] }
  0x73   :  { %v129_v48 = vrot.slane %v1588_v38, %v1593_v40  ;;  %v179_v49 = vrot.slane %v1590_v39, %v1593_v40  ;;  %v404_v2 = vunpack.c.l.s8.bf16 %v260_v63  ;;  %v406_v3 = vunpack.c.l.s8.bf16 %v262_v0 }
  0x74   :  { %v409_v4 = vunpack.c.h.s8.bf16 %v261_v56  ;;  %v411_v5 = vunpack.c.h.s8.bf16 %v263_v57  ;;  %v408_v8 = vunpack.c.h.s8.bf16 %v260_v63  ;;  %v410_v9 = vunpack.c.h.s8.bf16 %v262_v0  ;;  %v277_v57 = vld [vmem:[#allocation9 + $0x108] sm:$0xff] }
  0x75   :  { %633 = vmatpush1.bf16.msra.mxu0 %v380_v18  ;;  %797 = vmatpush1.bf16.msra.mxu1 %v382_v19  ;;  %v163_v50 = vmul.f32 %v129_v48, %v113_v43  ;;  %v413_v10 = vunpack.c.l.s8.bf16 %v265_v6  ;;  %v415_v11 = vunpack.c.l.s8.bf16 %v267_v7  ;;  %v412_v14 = vunpack.c.l.s8.bf16 %v264_v12  ;;  %v269_v18 = vld [vmem:[#allocation9 + $0xc8] sm:$0xff]  ;;  %v271_v19 = vld [vmem:[#allocation9 + $0xd8] sm:$0xff]  ;;  %v272_v48 = vld [vmem:[#allocation9 + $0xe0] sm:$0xff] }
  0x76   :  { %634 = vmatprep.subr.bf16.mxu0 %v385_v20  ;;  %798 = vmatprep.subr.bf16.mxu1 %v387_v21  ;;  %v414_v15 = vunpack.c.l.s8.bf16 %v266_v13  ;;  %v417_v16 = vunpack.c.h.s8.bf16 %v265_v6  ;;  %v419_v17 = vunpack.c.h.s8.bf16 %v267_v7  ;;  %v1600_v20 = vsub.s32 0, %v1586_v36  ;;  %v115_v43 = vld [vmem:[#allocation2 + $0x18] sm:$0xff] }
  0x77   :  { %v213_v55 = vadd.f32 %v179_v49, %v163_v50  ;;  %v416_v21 = vunpack.c.h.s8.bf16 %v264_v12  ;;  %v418_v22 = vunpack.c.h.s8.bf16 %v266_v13  ;;  %v421_v23 = vunpack.c.l.s8.bf16 %v269_v18  ;;  %v274_v49 = vld [vmem:[#allocation9 + $0xf0] sm:$0xff] }
  0x78   :  { %v125_v28 = vrot.slane %v1588_v38, %v1600_v20  ;;  %v431_v47 = vunpack.c.l.s8.bf16 %v275_v35  ;;  %v435_v56 = vunpack.c.h.s8.bf16 %v275_v35  ;;  %v437_v63 = vunpack.c.l.s8.bf16 %v277_v57 }
  0x79   :  { %635 = vmatpush1.bf16.msra.mxu0 %v384_v24  ;;  %799 = vmatpush1.bf16.msra.mxu1 %v386_v25  ;;  %v1203_v58 = vclamps-f32 %v213_v55, 5.0  ;;  %v423_v24 = vunpack.c.l.s8.bf16 %v271_v19  ;;  %v268_v25 = vld [vmem:[#allocation9 + $0xc0] sm:$0xff]  ;;  %v441_v7 = vunpack.c.h.s8.bf16 %v277_v57  ;;  %vm1163_vm0 = vcmp.lt.s32.totalorder %v1586_v36, 2 }
  0x7a   :  { %636 = vmatprep.subr.bf16.mxu0 %v389_v26  ;;  %800 = vmatprep.subr.bf16.mxu1 %v391_v27  ;;  %v270_v26 = vld [vmem:[#allocation9 + $0xd0] sm:$0xff]  ;;  %v1603_v27 = vsub.s32 3, %v1586_v36  ;;  %v420_v29 = vunpack.c.l.s8.bf16 %v268_v25 }
  0x7b   :  { %v237_v1 = vpack.c.bf16 %v1203_v58, %v1203_v58  ;;  %v422_v30 = vunpack.c.l.s8.bf16 %v270_v26  ;;  %v279_v58 = vld [vmem:[#allocation9 + $0x118] sm:$0xff] }
  0x7c   :  { %v137_v37 = vrot.slane %v1588_v38, %v1603_v27  ;;  %v439_v0 = vunpack.c.l.s8.bf16 %v279_v58 }
  0x7d   :  { %637 = vmatpush1.bf16.msra.mxu0 %v388_v31  ;;  %801 = vmatpush1.bf16.msra.mxu1 %v390_v32  ;;  %v112_v31 = vld [vmem:[#allocation2] sm:$0xff]  ;;  %v425_v32 = vunpack.c.h.s8.bf16 %v269_v18 }
  0x7e   :  { %638 = vmatprep.subr.bf16.mxu0 %v393_v33  ;;  %802 = vmatprep.subr.bf16.mxu1 %v395_v34  ;;  %v427_v33 = vunpack.c.h.s8.bf16 %v271_v19  ;;  %v273_v34 = vld [vmem:[#allocation9 + $0xe8] sm:$0xff]  ;;  %v165_v50 = vmul.f32 %v137_v37, %v115_v43 }
  0x7f   :  { %660 = vmatprep.mubr.bf16.mxu0 %v237_v1  ;;  %824 = vmatprep.mubr.bf16.mxu1 %v237_v1  ;;  %v429_v46 = vunpack.c.l.s8.bf16 %v273_v34  ;;  %v433_v55 = vunpack.c.h.s8.bf16 %v273_v34  ;;  %v276_v1 = vld [vmem:[#allocation9 + $0x100] sm:$0xff]  ;;  %v289_v37 = vld [vmem:[#allocation9 + $0x168] sm:$0xff] }
  0x80   :  { %v440_v12 = vunpack.c.h.s8.bf16 %v276_v1 }
  0x81   :  { %639 = vmatpush1.bf16.msra.mxu0 %v392_v41  ;;  %803 = vmatpush1.bf16.msra.mxu1 %v394_v42  ;;  %v162_v41 = vmul.f32 %v125_v28, %v112_v31  ;;  %v175_v42 = vrot.slane %v1590_v39, %v1600_v20  ;;  %v286_v31 = vld [vmem:[#allocation9 + $0x150] sm:$0xff] }
  0x82   :  { %640 = vmatprep.subr.bf16.mxu0 %v397_v44  ;;  %804 = vmatprep.subr.bf16.mxu1 %v399_v45  ;;  %v424_v44 = vunpack.c.h.s8.bf16 %v268_v25  ;;  %v426_v45 = vunpack.c.h.s8.bf16 %v270_v26  ;;  %v458_v43 = vunpack.c.h.s8.bf16 %v286_v31 }
  0x85   :  { %641 = vmatpush1.bf16.msra.mxu0 %v396_v51  ;;  %805 = vmatpush1.bf16.msra.mxu1 %v398_v52  ;;  %v187_v51 = vrot.slane %v1590_v39, %v1603_v27  ;;  %v212_v52 = vadd.f32 %v175_v42, %v162_v41  ;;  %v291_v41 = vld [vmem:[#allocation9 + $0x178] sm:$0xff] }
  0x86   :  { %642 = vmatprep.subr.bf16.mxu0 %v401_v53  ;;  %806 = vmatprep.subr.bf16.mxu1 %v403_v54  ;;  %v428_v53 = vunpack.c.l.s8.bf16 %v272_v48  ;;  %v430_v54 = vunpack.c.l.s8.bf16 %v274_v49 }
  0x89   :  { %643 = vmatpush1.bf16.msra.mxu0 %v400_v59  ;;  %807 = vmatpush1.bf16.msra.mxu1 %v402_v60  ;;  %v215_v59 = vadd.f32 %v187_v51, %v165_v50  ;;  %v1202_v60 = vclamps-f32 %v212_v52, 5.0  ;;  %v465_v50 = vunpack.c.h.s8.bf16 %v289_v37  ;;  %v467_v51 = vunpack.c.h.s8.bf16 %v291_v41  ;;  %v293_v52 = vld [vmem:[#allocation9 + $0x188] sm:$0xff] }
  0x8a   :  { %644 = vmatprep.subr.bf16.mxu0 %v405_v61  ;;  %808 = vmatprep.subr.bf16.mxu1 %v407_v62  ;;  %v432_v61 = vunpack.c.h.s8.bf16 %v272_v48  ;;  %v434_v62 = vunpack.c.h.s8.bf16 %v274_v49 }
  0x8d   :  { %645 = vmatpush1.bf16.msra.mxu0 %v404_v2  ;;  %809 = vmatpush1.bf16.msra.mxu1 %v406_v3  ;;  %v278_v2 = vld [vmem:[#allocation9 + $0x110] sm:$0xff]  ;;  %v1205_v3 = vclamps-f32 %v215_v59, 5.0 }
  0x8e   :  { %646 = vmatprep.subr.bf16.mxu0 %v409_v4  ;;  %810 = vmatprep.subr.bf16.mxu1 %v411_v5  ;;  %v236_v4 = vpack.c.bf16 %v1202_v60, %v1202_v60  ;;  %v436_v5 = vunpack.c.l.s8.bf16 %v276_v1  ;;  %v438_v6 = vunpack.c.l.s8.bf16 %v278_v2  ;;  %v442_v13 = vunpack.c.h.s8.bf16 %v278_v2  ;;  %v294_v59 = vld [vmem:[#allocation9 + $0x190] sm:$0xff]  ;;  %v299_v1 = vld [vmem:[#allocation9 + $0x1b8] sm:$0xff] }
  0x91   :  { %647 = vmatpush1.bf16.msra.mxu0 %v408_v8  ;;  %811 = vmatpush1.bf16.msra.mxu1 %v410_v9  ;;  %v443_v8 = vunpack.c.h.s8.bf16 %v279_v58  ;;  %v281_v9 = vld [vmem:[#allocation9 + $0x128] sm:$0xff]  ;;  %v292_v58 = vld [vmem:[#allocation9 + $0x180] sm:$0xff] }
  0x92   :  { %648 = vmatprep.subr.bf16.mxu0 %v413_v10  ;;  %812 = vmatprep.subr.bf16.mxu1 %v415_v11  ;;  %v283_v10 = vld [vmem:[#allocation9 + $0x138] sm:$0xff]  ;;  %v239_v11 = vpack.c.bf16 %v1205_v3, %v1205_v3  ;;  %v468_v60 = vunpack.c.l.s8.bf16 %v292_v58  ;;  %v472_v2 = vunpack.c.h.s8.bf16 %v292_v58  ;;  %v474_v3 = vunpack.c.h.s8.bf16 %v294_v59 }
  0x95   :  { %649 = vmatpush1.bf16.msra.mxu0 %v412_v14  ;;  %813 = vmatpush1.bf16.msra.mxu1 %v414_v15  ;;  %v445_v14 = vunpack.c.l.s8.bf16 %v281_v9  ;;  %v447_v15 = vunpack.c.l.s8.bf16 %v283_v10 }
  0x96   :  { %650 = vmatprep.subr.bf16.mxu0 %v417_v16  ;;  %814 = vmatprep.subr.bf16.mxu1 %v419_v17  ;;  %v280_v16 = vld [vmem:[#allocation9 + $0x120] sm:$0xff]  ;;  %v282_v17 = vld [vmem:[#allocation9 + $0x130] sm:$0xff] }
  0x97   :  { %v444_v18 = vunpack.c.l.s8.bf16 %v280_v16  ;;  %v446_v19 = vunpack.c.l.s8.bf16 %v282_v17  ;;  %v448_v25 = vunpack.c.h.s8.bf16 %v280_v16  ;;  %v450_v26 = vunpack.c.h.s8.bf16 %v282_v17 }
  0x99   :  { %651 = vmatpush1.bf16.msra.mxu0 %v416_v21  ;;  %815 = vmatpush1.bf16.msra.mxu1 %v418_v22  ;;  %v449_v21 = vunpack.c.h.s8.bf16 %v281_v9  ;;  %v451_v22 = vunpack.c.h.s8.bf16 %v283_v10 }
  0x9a   :  { %652 = vmatprep.subr.bf16.mxu0 %v421_v23  ;;  %816 = vmatprep.subr.bf16.mxu1 %v423_v24  ;;  %v285_v23 = vld [vmem:[#allocation9 + $0x148] sm:$0xff]  ;;  %v287_v24 = vld [vmem:[#allocation9 + $0x158] sm:$0xff] }
  0x9b   :  { %v453_v28 = vunpack.c.l.s8.bf16 %v285_v23  ;;  %v457_v34 = vunpack.c.h.s8.bf16 %v285_v23  ;;  %v459_v35 = vunpack.c.h.s8.bf16 %v287_v24 }
  0x9d   :  { %653 = vmatpush1.bf16.msra.mxu0 %v420_v29  ;;  %817 = vmatpush1.bf16.msra.mxu1 %v422_v30  ;;  %v455_v29 = vunpack.c.l.s8.bf16 %v287_v24  ;;  %v284_v30 = vld [vmem:[#allocation9 + $0x140] sm:$0xff] }
  0x9e   :  { %654 = vmatprep.subr.bf16.mxu0 %v425_v32  ;;  %818 = vmatprep.subr.bf16.mxu1 %v427_v33  ;;  %v452_v32 = vunpack.c.l.s8.bf16 %v284_v30  ;;  %v454_v33 = vunpack.c.l.s8.bf16 %v286_v31  ;;  %v456_v42 = vunpack.c.h.s8.bf16 %v284_v30  ;;  %v305_v30 = vld [vmem:[#allocation9 + $0x1e8] sm:$0xff]  ;;  %v307_v31 = vld [vmem:[#allocation9 + $0x1f8] sm:$0xff] }
  0xa1   :  { %655 = vmatpush1.bf16.msra.mxu0 %v424_v44  ;;  %819 = vmatpush1.bf16.msra.mxu1 %v426_v45  ;;  %v461_v44 = vunpack.c.l.s8.bf16 %v289_v37  ;;  %v463_v45 = vunpack.c.l.s8.bf16 %v291_v41 }
  0xa2   :  { %656 = vmatprep.subr.bf16.mxu0 %v429_v46  ;;  %820 = vmatprep.subr.bf16.mxu1 %v431_v47  ;;  %v288_v46 = vld [vmem:[#allocation9 + $0x160] sm:$0xff]  ;;  %v290_v47 = vld [vmem:[#allocation9 + $0x170] sm:$0xff] }
  0xa3   :  { %v460_v48 = vunpack.c.l.s8.bf16 %v288_v46  ;;  %v462_v49 = vunpack.c.l.s8.bf16 %v290_v47 }
  0xa5   :  { %657 = vmatpush1.bf16.msra.mxu0 %v428_v53  ;;  %821 = vmatpush1.bf16.msra.mxu1 %v430_v54  ;;  %v295_v53 = vld [vmem:[#allocation9 + $0x198] sm:$0xff]  ;;  %v464_v54 = vunpack.c.h.s8.bf16 %v288_v46 }
  0xa6   :  { %658 = vmatprep.subr.bf16.mxu0 %v433_v55  ;;  %822 = vmatprep.subr.bf16.mxu1 %v435_v56  ;;  %v466_v55 = vunpack.c.h.s8.bf16 %v290_v47  ;;  %v469_v56 = vunpack.c.l.s8.bf16 %v293_v52  ;;  %v471_v57 = vunpack.c.l.s8.bf16 %v295_v53 }
  0xa9   :  { %659 = vmatpush1.bf16.msra.mxu0 %v432_v61  ;;  %823 = vmatpush1.bf16.msra.mxu1 %v434_v62  ;;  %v470_v61 = vunpack.c.l.s8.bf16 %v294_v59  ;;  %v473_v62 = vunpack.c.h.s8.bf16 %v293_v52  ;;  %v499_v52 = vunpack.c.h.s8.bf16 %v307_v31 }
  0xaa   :  { %669 = vmatprep.subr.bf16.mxu0 %v437_v63  ;;  %833 = vmatprep.subr.bf16.mxu1 %v439_v0  ;;  %v475_v63 = vunpack.c.h.s8.bf16 %v295_v53  ;;  %v297_v0 = vld [vmem:[#allocation9 + $0x1a8] sm:$0xff] }
  0xab   :  { %v481_v10 = vunpack.c.h.s8.bf16 %v297_v0  ;;  %v309_v53 = vld [vmem:[#allocation9 + $0x208] sm:$0xff] }
  0xac   :  { %661 = vmatmul.mubr.bf16.vlgmr.msra.gmra.mrb[0].mxu0 %v236_v4  ;;  %825 = vmatmul.mubr.bf16.vlgmr.msra.gmra.mrb[0].mxu1 %v236_v4  ;;  %v477_v4 = vunpack.c.l.s8.bf16 %v297_v0  ;;  %v501_v59 = vunpack.c.l.s8.bf16 %v309_v53 }
  0xad   :  { %670 = vmatpush1.bf16.msra.mxu0 %v436_v5  ;;  %834 = vmatpush1.bf16.msra.mxu1 %v438_v6  ;;  %v479_v5 = vunpack.c.l.s8.bf16 %v299_v1  ;;  %v296_v6 = vld [vmem:[#allocation9 + $0x1a0] sm:$0xff] }
  0xae   :  { %671 = vmatprep.subr.bf16.mxu0 %v441_v7  ;;  %835 = vmatprep.subr.bf16.mxu1 %v443_v8  ;;  %v298_v7 = vld [vmem:[#allocation9 + $0x1b0] sm:$0xff]  ;;  %v476_v8 = vunpack.c.l.s8.bf16 %v296_v6 }
  0xaf   :  { %701 = vmatprep.mubr.bf16.mxu0 %v239_v11  ;;  %865 = vmatprep.mubr.bf16.mxu1 %v239_v11  ;;  %v478_v9 = vunpack.c.l.s8.bf16 %v298_v7  ;;  %v483_v11 = vunpack.c.h.s8.bf16 %v299_v1  ;;  %v482_v16 = vunpack.c.h.s8.bf16 %v298_v7 }
  0xb1   :  { %672 = vmatpush1.bf16.msra.mxu0 %v440_v12  ;;  %836 = vmatpush1.bf16.msra.mxu1 %v442_v13  ;;  %v301_v12 = vld [vmem:[#allocation9 + $0x1c8] sm:$0xff]  ;;  %v303_v13 = vld [vmem:[#allocation9 + $0x1d8] sm:$0xff] }
  0xb2   :  { %673 = vmatprep.subr.bf16.mxu0 %v445_v14  ;;  %837 = vmatprep.subr.bf16.mxu1 %v447_v15  ;;  %v1614_v14 = vsub.s32 2, %v1586_v36  ;;  %v480_v15 = vunpack.c.h.s8.bf16 %v296_v6  ;;  %v485_v17 = vunpack.c.l.s8.bf16 %v301_v12  ;;  %v315_v6 = vld [vmem:[#allocation9 + $0x238] sm:$0xff] }
  0xb4   :  { %v133_v23 = vrot.slane %v1588_v38, %v1614_v14 }
  0xb5   :  { %674 = vmatpush1.bf16.msra.mxu0 %v444_v18  ;;  %838 = vmatpush1.bf16.msra.mxu1 %v446_v19  ;;  %v487_v18 = vunpack.c.l.s8.bf16 %v303_v13  ;;  %v300_v19 = vld [vmem:[#allocation9 + $0x1c0] sm:$0xff] }
  0xb6   :  { %675 = vmatprep.subr.bf16.mxu0 %v449_v21  ;;  %839 = vmatprep.subr.bf16.mxu1 %v451_v22  ;;  %v302_v21 = vld [vmem:[#allocation9 + $0x1d0] sm:$0xff]  ;;  %v144_v22 = vsub.s32 5, %v1586_v36  ;;  %v484_v24 = vunpack.c.l.s8.bf16 %v300_v19  ;;  %v488_v37 = vunpack.c.h.s8.bf16 %v300_v19  ;;  %v317_v19 = vld [vmem:[#allocation9 + $0x248] sm:$0xff] }
  0xb7   :  { %v490_v41 = vunpack.c.h.s8.bf16 %v302_v21 }
  0xb8   :  { %v195_v47 = vrot.slane %v1590_v39, %v144_v22 }
  0xb9   :  { %676 = vmatpush1.bf16.msra.mxu0 %v448_v25  ;;  %840 = vmatpush1.bf16.msra.mxu1 %v450_v26  ;;  %v486_v25 = vunpack.c.l.s8.bf16 %v302_v21  ;;  %v114_v26 = vld [vmem:[#allocation2 + $0x10] sm:$0xff]  ;;  %v319_v21 = vld [vmem:[#allocation9 + $0x258] sm:$0xff] }
  0xba   :  { %677 = vmatprep.subr.bf16.mxu0 %v453_v28  ;;  %841 = vmatprep.subr.bf16.mxu1 %v455_v29  ;;  %v489_v28 = vunpack.c.h.s8.bf16 %v301_v12  ;;  %v491_v29 = vunpack.c.h.s8.bf16 %v303_v13  ;;  %v312_v12 = vld [vmem:[#allocation9 + $0x220] sm:$0xff]  ;;  %v314_v13 = vld [vmem:[#allocation9 + $0x230] sm:$0xff] }
  0xbd   :  { %678 = vmatpush1.bf16.msra.mxu0 %v452_v32  ;;  %842 = vmatpush1.bf16.msra.mxu1 %v454_v33  ;;  %v145_v32 = vrot.slane %v1588_v38, %v144_v22  ;;  %v164_v33 = vmul.f32 %v133_v23, %v114_v26  ;;  %v512_v22 = vunpack.c.h.s8.bf16 %v312_v12  ;;  %v514_v23 = vunpack.c.h.s8.bf16 %v314_v13  ;;  %v316_v26 = vld [vmem:[#allocation9 + $0x240] sm:$0xff] }
  0xbe   :  { %679 = vmatprep.subr.bf16.mxu0 %v457_v34  ;;  %843 = vmatprep.subr.bf16.mxu1 %v459_v35  ;;  %v183_v34 = vrot.slane %v1590_v39, %v1614_v14  ;;  %v117_v35 = vld [vmem:[#allocation2 + $0x28] sm:$0xff] }
  0xbf   :  { %v167_v46 = vmul.f32 %v145_v32, %v117_v35  ;;  %v523_v32 = vunpack.c.h.s8.bf16 %v319_v21  ;;  %v520_v35 = vunpack.c.h.s8.bf16 %v316_v26 }
  0xc1   :  { %680 = vmatpush1.bf16.msra.mxu0 %v456_v42  ;;  %844 = vmatpush1.bf16.msra.mxu1 %v458_v43  ;;  %v493_v42 = vunpack.c.l.s8.bf16 %v305_v30  ;;  %v495_v43 = vunpack.c.l.s8.bf16 %v307_v31  ;;  %v521_v31 = vunpack.c.h.s8.bf16 %v317_v19 }
  0xc2   :  { %681 = vmatprep.subr.bf16.mxu0 %v461_v44  ;;  %845 = vmatprep.subr.bf16.mxu1 %v463_v45  ;;  %v304_v44 = vld [vmem:[#allocation9 + $0x1e0] sm:$0xff]  ;;  %v306_v45 = vld [vmem:[#allocation9 + $0x1f0] sm:$0xff] }
  0xc3   :  { %v498_v58 = vunpack.c.h.s8.bf16 %v306_v45 }
  0xc5   :  { %682 = vmatpush1.bf16.msra.mxu0 %v460_v48  ;;  %846 = vmatpush1.bf16.msra.mxu1 %v462_v49  ;;  %v214_v48 = vadd.f32 %v183_v34, %v164_v33  ;;  %v492_v49 = vunpack.c.l.s8.bf16 %v304_v44  ;;  %v321_v33 = vld [vmem:[#allocation9 + $0x268] sm:$0xff]  ;;  %v323_v34 = vld [vmem:[#allocation9 + $0x278] sm:$0xff] }
  0xc6   :  { %683 = vmatprep.subr.bf16.mxu0 %v465_v50  ;;  %847 = vmatprep.subr.bf16.mxu1 %v467_v51  ;;  %v494_v50 = vunpack.c.l.s8.bf16 %v306_v45  ;;  %v497_v51 = vunpack.c.h.s8.bf16 %v305_v30 }
  0xc9   :  { %684 = vmatpush1.bf16.msra.mxu0 %v464_v54  ;;  %848 = vmatpush1.bf16.msra.mxu1 %v466_v55  ;;  %v311_v54 = vld [vmem:[#allocation9 + $0x218] sm:$0xff]  ;;  %v217_v55 = vadd.f32 %v195_v47, %v167_v46  ;;  %v529_v47 = vunpack.c.h.s8.bf16 %v321_v33 }
  0xca   :  { %685 = vmatprep.subr.bf16.mxu0 %v469_v56  ;;  %849 = vmatprep.subr.bf16.mxu1 %v471_v57  ;;  %v1204_v56 = vclamps-f32 %v214_v48, 5.0  ;;  %v496_v57 = vunpack.c.h.s8.bf16 %v304_v44  ;;  %v322_v44 = vld [vmem:[#allocation9 + $0x270] sm:$0xff]  ;;  %v531_v48 = vunpack.c.h.s8.bf16 %v323_v34 }
  0xcb   :  { %v526_v46 = vunpack.c.l.s8.bf16 %v322_v44 }
  0xcc   :  { %v238_v0 = vpack.c.bf16 %v1204_v56, %v1204_v56  ;;  %v326_v56 = vld [vmem:[#allocation9 + $0x290] sm:$0xff] }
  0xcd   :  { %686 = vmatpush1.bf16.msra.mxu0 %v468_v60  ;;  %850 = vmatpush1.bf16.msra.mxu1 %v470_v61  ;;  %v503_v60 = vunpack.c.l.s8.bf16 %v311_v54  ;;  %v308_v61 = vld [vmem:[#allocation9 + $0x200] sm:$0xff] }
  0xce   :  { %687 = vmatprep.subr.bf16.mxu0 %v473_v62  ;;  %851 = vmatprep.subr.bf16.mxu1 %v475_v63  ;;  %v310_v62 = vld [vmem:[#allocation9 + $0x210] sm:$0xff]  ;;  %v1207_v63 = vclamps-f32 %v217_v55, 5.0  ;;  %v500_v1 = vunpack.c.l.s8.bf16 %v308_v61  ;;  %v324_v55 = vld [vmem:[#allocation9 + $0x280] sm:$0xff] }
  0xd0   :  { %v241_v7 = vpack.c.bf16 %v1207_v63, %v1207_v63  ;;  %v536_v63 = vunpack.c.h.s8.bf16 %v324_v55 }
  0xd1   :  { %688 = vmatpush1.bf16.msra.mxu0 %v472_v2  ;;  %852 = vmatpush1.bf16.msra.mxu1 %v474_v3  ;;  %v502_v2 = vunpack.c.l.s8.bf16 %v310_v62  ;;  %v505_v3 = vunpack.c.h.s8.bf16 %v309_v53 }
  0xd2   :  { %689 = vmatprep.subr.bf16.mxu0 %v477_v4  ;;  %853 = vmatprep.subr.bf16.mxu1 %v479_v5  ;;  %v507_v4 = vunpack.c.h.s8.bf16 %v311_v54  ;;  %v313_v5 = vld [vmem:[#allocation9 + $0x228] sm:$0xff] }
  0xd5   :  { %690 = vmatpush1.bf16.msra.mxu0 %v476_v8  ;;  %854 = vmatpush1.bf16.msra.mxu1 %v478_v9  ;;  %v504_v8 = vunpack.c.h.s8.bf16 %v308_v61  ;;  %v506_v9 = vunpack.c.h.s8.bf16 %v310_v62  ;;  %v329_v61 = vld [vmem:[#allocation9 + $0x2a8] sm:$0xff]  ;;  %v331_v62 = vld [vmem:[#allocation9 + $0x2b8] sm:$0xff] }
  0xd6   :  { %691 = vmatprep.subr.bf16.mxu0 %v481_v10  ;;  %855 = vmatprep.subr.bf16.mxu1 %v483_v11  ;;  %v509_v10 = vunpack.c.l.s8.bf16 %v313_v5  ;;  %v511_v11 = vunpack.c.l.s8.bf16 %v315_v6 }
  0xd9   :  { %692 = vmatpush1.bf16.msra.mxu0 %v480_v15  ;;  %856 = vmatpush1.bf16.msra.mxu1 %v482_v16  ;;  %v508_v15 = vunpack.c.l.s8.bf16 %v312_v12  ;;  %v510_v16 = vunpack.c.l.s8.bf16 %v314_v13 }
  0xda   :  { %693 = vmatprep.subr.bf16.mxu0 %v485_v17  ;;  %857 = vmatprep.subr.bf16.mxu1 %v487_v18  ;;  %v513_v17 = vunpack.c.h.s8.bf16 %v313_v5  ;;  %v515_v18 = vunpack.c.h.s8.bf16 %v315_v6 }
  0xdd   :  { %694 = vmatpush1.bf16.msra.mxu0 %v484_v24  ;;  %858 = vmatpush1.bf16.msra.mxu1 %v486_v25  ;;  %v517_v24 = vunpack.c.l.s8.bf16 %v317_v19  ;;  %v519_v25 = vunpack.c.l.s8.bf16 %v319_v21  ;;  %v152_v19 = vsub.s32 7, %v1586_v36 }
  0xde   :  { %695 = vmatprep.subr.bf16.mxu0 %v489_v28  ;;  %859 = vmatprep.subr.bf16.mxu1 %v491_v29  ;;  %v318_v28 = vld [vmem:[#allocation9 + $0x250] sm:$0xff]  ;;  %v516_v29 = vunpack.c.l.s8.bf16 %v316_v26 }
  0xdf   :  { %v518_v30 = vunpack.c.l.s8.bf16 %v318_v28 }
  0xe1   :  { %696 = vmatpush1.bf16.msra.mxu0 %v488_v37  ;;  %860 = vmatpush1.bf16.msra.mxu1 %v490_v41  ;;  %v522_v37 = vunpack.c.h.s8.bf16 %v318_v28  ;;  %v525_v41 = vunpack.c.l.s8.bf16 %v321_v33  ;;  %v337_v28 = vld [vmem:[#allocation9 + $0x2e8] sm:$0xff] }
  0xe2   :  { %697 = vmatprep.subr.bf16.mxu0 %v493_v42  ;;  %861 = vmatprep.subr.bf16.mxu1 %v495_v43  ;;  %v527_v42 = vunpack.c.l.s8.bf16 %v323_v34  ;;  %v320_v43 = vld [vmem:[#allocation9 + $0x260] sm:$0xff]  ;;  %v119_v33 = vld [vmem:[#allocation2 + $0x38] sm:$0xff] }
  0xe3   :  { %v524_v45 = vunpack.c.l.s8.bf16 %v320_v43 }
  0xe5   :  { %698 = vmatpush1.bf16.msra.mxu0 %v492_v49  ;;  %862 = vmatpush1.bf16.msra.mxu1 %v494_v50  ;;  %v325_v49 = vld [vmem:[#allocation9 + $0x288] sm:$0xff]  ;;  %v327_v50 = vld [vmem:[#allocation9 + $0x298] sm:$0xff] }
  0xe6   :  { %699 = vmatprep.subr.bf16.mxu0 %v497_v51  ;;  %863 = vmatprep.subr.bf16.mxu1 %v499_v52  ;;  %v528_v51 = vunpack.c.h.s8.bf16 %v320_v43  ;;  %v530_v52 = vunpack.c.h.s8.bf16 %v322_v44  ;;  %v533_v53 = vunpack.c.l.s8.bf16 %v325_v49  ;;  %v535_v54 = vunpack.c.l.s8.bf16 %v327_v50  ;;  %v338_v43 = vld [vmem:[#allocation9 + $0x2f0] sm:$0xff] }
  0xe9   :  { %700 = vmatpush1.bf16.msra.mxu0 %v496_v57  ;;  %864 = vmatpush1.bf16.msra.mxu1 %v498_v58  ;;  %v532_v57 = vunpack.c.l.s8.bf16 %v324_v55  ;;  %v534_v58 = vunpack.c.l.s8.bf16 %v326_v56  ;;  %v562_v55 = vunpack.c.h.s8.bf16 %v338_v43 }
  0xea   :  { %710 = vmatprep.subr.bf16.mxu0 %v501_v59  ;;  %874 = vmatprep.subr.bf16.mxu1 %v503_v60  ;;  %v537_v59 = vunpack.c.h.s8.bf16 %v325_v49  ;;  %v539_v60 = vunpack.c.h.s8.bf16 %v327_v50  ;;  %v341_v50 = vld [vmem:[#allocation9 + $0x308] sm:$0xff] }
  0xec   :  { %702 = vmatmul.mubr.bf16.vlgmr.msra.gmra.mrb[0].mxu0 %v238_v0  ;;  %866 = vmatmul.mubr.bf16.vlgmr.msra.gmra.mrb[0].mxu1 %v238_v0  ;;  %v538_v0 = vunpack.c.h.s8.bf16 %v326_v56 }
  0xed   :  { %711 = vmatpush1.bf16.msra.mxu0 %v500_v1  ;;  %875 = vmatpush1.bf16.msra.mxu1 %v502_v2  ;;  %v541_v1 = vunpack.c.l.s8.bf16 %v329_v61  ;;  %v543_v2 = vunpack.c.l.s8.bf16 %v331_v62 }
  0xee   :  { %712 = vmatprep.subr.bf16.mxu0 %v505_v3  ;;  %876 = vmatprep.subr.bf16.mxu1 %v507_v4  ;;  %v328_v3 = vld [vmem:[#allocation9 + $0x2a0] sm:$0xff]  ;;  %v330_v4 = vld [vmem:[#allocation9 + $0x2b0] sm:$0xff] }
  0xef   :  { %742 = vmatprep.mubr.bf16.mxu0 %v241_v7  ;;  %906 = vmatprep.mubr.bf16.mxu1 %v241_v7  ;;  %v540_v5 = vunpack.c.l.s8.bf16 %v328_v3  ;;  %v542_v6 = vunpack.c.l.s8.bf16 %v330_v4  ;;  %v545_v7 = vunpack.c.h.s8.bf16 %v329_v61  ;;  %v544_v12 = vunpack.c.h.s8.bf16 %v328_v3 }
  0xf0   :  { %v546_v13 = vunpack.c.h.s8.bf16 %v330_v4 }
  0xf1   :  { %713 = vmatpush1.bf16.msra.mxu0 %v504_v8  ;;  %877 = vmatpush1.bf16.msra.mxu1 %v506_v9  ;;  %v547_v8 = vunpack.c.h.s8.bf16 %v331_v62  ;;  %v333_v9 = vld [vmem:[#allocation9 + $0x2c8] sm:$0xff] }
  0xf2   :  { %714 = vmatprep.subr.bf16.mxu0 %v509_v10  ;;  %878 = vmatprep.subr.bf16.mxu1 %v511_v11  ;;  %v335_v10 = vld [vmem:[#allocation9 + $0x2d8] sm:$0xff]  ;;  %v140_v11 = vsub.s32 4, %v1586_v36 }
  0xf3   :  { %v555_v26 = vunpack.c.h.s8.bf16 %v335_v10 }
  0xf4   :  { %v141_v21 = vrot.slane %v1588_v38, %v140_v11 }
  0xf5   :  { %715 = vmatpush1.bf16.msra.mxu0 %v508_v15  ;;  %879 = vmatpush1.bf16.msra.mxu1 %v510_v16  ;;  %v549_v15 = vunpack.c.l.s8.bf16 %v333_v9  ;;  %v551_v16 = vunpack.c.l.s8.bf16 %v335_v10 }
  0xf6   :  { %716 = vmatprep.subr.bf16.mxu0 %v513_v17  ;;  %880 = vmatprep.subr.bf16.mxu1 %v515_v18  ;;  %v332_v17 = vld [vmem:[#allocation9 + $0x2c0] sm:$0xff]  ;;  %v334_v18 = vld [vmem:[#allocation9 + $0x2d0] sm:$0xff] }
  0xf7   :  { %v552_v34 = vunpack.c.h.s8.bf16 %v332_v17 }
  0xf9   :  { %717 = vmatpush1.bf16.msra.mxu0 %v512_v22  ;;  %881 = vmatpush1.bf16.msra.mxu1 %v514_v23  ;;  %v548_v22 = vunpack.c.l.s8.bf16 %v332_v17  ;;  %v550_v23 = vunpack.c.l.s8.bf16 %v334_v18 }
  0xfa   :  { %718 = vmatprep.subr.bf16.mxu0 %v517_v24  ;;  %882 = vmatprep.subr.bf16.mxu1 %v519_v25  ;;  %v116_v24 = vld [vmem:[#allocation2 + $0x20] sm:$0xff]  ;;  %v553_v25 = vunpack.c.h.s8.bf16 %v333_v9 }
  0xfb   :  { %v346_v9 = vld [vmem:[#allocation9 + $0x330] sm:$0xff] }
  0xfd   :  { %719 = vmatpush1.bf16.msra.mxu0 %v516_v29  ;;  %883 = vmatpush1.bf16.msra.mxu1 %v518_v30  ;;  %v339_v29 = vld [vmem:[#allocation9 + $0x2f8] sm:$0xff]  ;;  %v153_v30 = vrot.slane %v1588_v38, %v152_v19 }
  0xfe   :  { %720 = vmatprep.subr.bf16.mxu0 %v521_v31  ;;  %884 = vmatprep.subr.bf16.mxu1 %v523_v32  ;;  %v166_v31 = vmul.f32 %v141_v21, %v116_v24  ;;  %v191_v32 = vrot.slane %v1590_v39, %v140_v11  ;;  %v563_v49 = vunpack.c.h.s8.bf16 %v339_v29  ;;  %v574_v11 = vunpack.c.l.s8.bf16 %v346_v9 }
  0xff   :  { %v169_v44 = vmul.f32 %v153_v30, %v119_v33  ;;  %v355_v30 = vld [vmem:[#allocation9 + $0x378] sm:$0xff] }
 0x101   :  { %721 = vmatpush1.bf16.msra.mxu0 %v520_v35  ;;  %885 = vmatpush1.bf16.msra.mxu1 %v522_v37  ;;  %v554_v35 = vunpack.c.h.s8.bf16 %v334_v18  ;;  %v557_v37 = vunpack.c.l.s8.bf16 %v337_v28  ;;  %v578_v18 = vunpack.c.h.s8.bf16 %v346_v9 }
 0x102   :  { %722 = vmatprep.subr.bf16.mxu0 %v525_v41  ;;  %886 = vmatprep.subr.bf16.mxu1 %v527_v42  ;;  %v559_v41 = vunpack.c.l.s8.bf16 %v339_v29  ;;  %v336_v42 = vld [vmem:[#allocation9 + $0x2e0] sm:$0xff]  ;;  %v353_v29 = vld [vmem:[#allocation9 + $0x368] sm:$0xff] }
 0x103   :  { %v556_v38 = vunpack.c.l.s8.bf16 %v336_v42  ;;  %v589_v33 = vunpack.c.l.s8.bf16 %v353_v29 }
 0x105   :  { %723 = vmatpush1.bf16.msra.mxu0 %v524_v45  ;;  %887 = vmatpush1.bf16.msra.mxu1 %v526_v46  ;;  %v203_v45 = vrot.slane %v1590_v39, %v152_v19  ;;  %v216_v46 = vadd.f32 %v191_v32, %v166_v31  ;;  %v565_v39 = vunpack.c.l.s8.bf16 %v341_v50 }
 0x106   :  { %724 = vmatprep.subr.bf16.mxu0 %v529_v47  ;;  %888 = vmatprep.subr.bf16.mxu1 %v531_v48  ;;  %v558_v47 = vunpack.c.l.s8.bf16 %v338_v43  ;;  %v561_v48 = vunpack.c.h.s8.bf16 %v337_v28  ;;  %v593_v43 = vunpack.c.h.s8.bf16 %v353_v29 }
 0x109   :  { %725 = vmatpush1.bf16.msra.mxu0 %v528_v51  ;;  %889 = vmatpush1.bf16.msra.mxu1 %v530_v52  ;;  %v343_v51 = vld [vmem:[#allocation9 + $0x318] sm:$0xff]  ;;  %v219_v52 = vadd.f32 %v203_v45, %v169_v44  ;;  %v595_v44 = vunpack.c.h.s8.bf16 %v355_v30  ;;  %v357_v45 = vld [vmem:[#allocation9 + $0x388] sm:$0xff] }
 0x10a   :  { %726 = vmatprep.subr.bf16.mxu0 %v533_v53  ;;  %890 = vmatprep.subr.bf16.mxu1 %v535_v54  ;;  %v1206_v53 = vclamps-f32 %v216_v46, 5.0  ;;  %v560_v54 = vunpack.c.h.s8.bf16 %v336_v42  ;;  %v567_v56 = vunpack.c.l.s8.bf16 %v343_v51  ;;  %v359_v46 = vld [vmem:[#allocation9 + $0x398] sm:$0xff] }
 0x10d   :  { %727 = vmatpush1.bf16.msra.mxu0 %v532_v57  ;;  %891 = vmatpush1.bf16.msra.mxu1 %v534_v58  ;;  %v340_v57 = vld [vmem:[#allocation9 + $0x300] sm:$0xff]  ;;  %v342_v58 = vld [vmem:[#allocation9 + $0x310] sm:$0xff] }
 0x10e   :  { %728 = vmatprep.subr.bf16.mxu0 %v537_v59  ;;  %892 = vmatprep.subr.bf16.mxu1 %v539_v60  ;;  %v1209_v59 = vclamps-f32 %v219_v52, 5.0  ;;  %v240_v60 = vpack.c.bf16 %v1206_v53, %v1206_v53  ;;  %v564_v61 = vunpack.c.l.s8.bf16 %v340_v57  ;;  %v566_v62 = vunpack.c.l.s8.bf16 %v342_v58 }
 0x10f   :  { %v568_v4 = vunpack.c.h.s8.bf16 %v340_v57 }
 0x110   :  { %v243_v3 = vpack.c.bf16 %v1209_v59, %v1209_v59 }
 0x111   :  { %729 = vmatpush1.bf16.msra.mxu0 %v536_v63  ;;  %893 = vmatpush1.bf16.msra.mxu1 %v538_v0  ;;  %v569_v63 = vunpack.c.h.s8.bf16 %v341_v50  ;;  %v571_v0 = vunpack.c.h.s8.bf16 %v343_v51  ;;  %v356_v50 = vld [vmem:[#allocation9 + $0x380] sm:$0xff]  ;;  %v358_v51 = vld [vmem:[#allocation9 + $0x390] sm:$0xff] }
 0x112   :  { %730 = vmatprep.subr.bf16.mxu0 %v541_v1  ;;  %894 = vmatprep.subr.bf16.mxu1 %v543_v2  ;;  %v345_v1 = vld [vmem:[#allocation9 + $0x328] sm:$0xff]  ;;  %v347_v2 = vld [vmem:[#allocation9 + $0x338] sm:$0xff]  ;;  %v596_v52 = vunpack.c.l.s8.bf16 %v356_v50  ;;  %v598_v53 = vunpack.c.l.s8.bf16 %v358_v51  ;;  %v600_v57 = vunpack.c.h.s8.bf16 %v356_v50 }
 0x115   :  { %731 = vmatpush1.bf16.msra.mxu0 %v540_v5  ;;  %895 = vmatpush1.bf16.msra.mxu1 %v542_v6  ;;  %v570_v5 = vunpack.c.h.s8.bf16 %v342_v58  ;;  %v573_v6 = vunpack.c.l.s8.bf16 %v345_v1  ;;  %v602_v58 = vunpack.c.h.s8.bf16 %v358_v51 }
 0x116   :  { %732 = vmatprep.subr.bf16.mxu0 %v545_v7  ;;  %896 = vmatprep.subr.bf16.mxu1 %v547_v8  ;;  %v575_v7 = vunpack.c.l.s8.bf16 %v347_v2  ;;  %v344_v8 = vld [vmem:[#allocation9 + $0x320] sm:$0xff] }
 0x117   :  { %v572_v10 = vunpack.c.l.s8.bf16 %v344_v8  ;;  %v576_v17 = vunpack.c.h.s8.bf16 %v344_v8 }
 0x119   :  { %733 = vmatpush1.bf16.msra.mxu0 %v544_v12  ;;  %897 = vmatpush1.bf16.msra.mxu1 %v546_v13  ;;  %v577_v12 = vunpack.c.h.s8.bf16 %v345_v1  ;;  %v579_v13 = vunpack.c.h.s8.bf16 %v347_v2 }
 0x11a   :  { %734 = vmatprep.subr.bf16.mxu0 %v549_v15  ;;  %898 = vmatprep.subr.bf16.mxu1 %v551_v16  ;;  %v349_v15 = vld [vmem:[#allocation9 + $0x348] sm:$0xff]  ;;  %v351_v16 = vld [vmem:[#allocation9 + $0x358] sm:$0xff] }
 0x11b   :  { %v581_v19 = vunpack.c.l.s8.bf16 %v349_v15  ;;  %v583_v21 = vunpack.c.l.s8.bf16 %v351_v16  ;;  %v587_v28 = vunpack.c.h.s8.bf16 %v351_v16 }
 0x11d   :  { %735 = vmatpush1.bf16.msra.mxu0 %v548_v22  ;;  %899 = vmatpush1.bf16.msra.mxu1 %v550_v23  ;;  %v348_v22 = vld [vmem:[#allocation9 + $0x340] sm:$0xff]  ;;  %v350_v23 = vld [vmem:[#allocation9 + $0x350] sm:$0xff] }
 0x11e   :  { %736 = vmatprep.subr.bf16.mxu0 %v553_v25  ;;  %900 = vmatprep.subr.bf16.mxu1 %v555_v26  ;;  %v580_v24 = vunpack.c.l.s8.bf16 %v348_v22  ;;  %v582_v25 = vunpack.c.l.s8.bf16 %v350_v23  ;;  %v585_v26 = vunpack.c.h.s8.bf16 %v349_v15  ;;  %v584_v31 = vunpack.c.h.s8.bf16 %v348_v22  ;;  %v371_v22 = vld [vmem:[#allocation9 + $0x3f8] sm:$0xff] }
 0x11f   :  { %v586_v32 = vunpack.c.h.s8.bf16 %v350_v23 }
 0x121   :  { %737 = vmatpush1.bf16.msra.mxu0 %v552_v34  ;;  %901 = vmatpush1.bf16.msra.mxu1 %v554_v35  ;;  %v591_v34 = vunpack.c.l.s8.bf16 %v355_v30  ;;  %v352_v35 = vld [vmem:[#allocation9 + $0x360] sm:$0xff]  ;;  %v623_v30 = vunpack.c.l.s8.bf16 %v371_v22 }
 0x122   :  { %738 = vmatprep.subr.bf16.mxu0 %v557_v37  ;;  %902 = vmatprep.subr.bf16.mxu1 %v559_v41  ;;  %v354_v37 = vld [vmem:[#allocation9 + $0x370] sm:$0xff]  ;;  %v588_v41 = vunpack.c.l.s8.bf16 %v352_v35 }
 0x123   :  { %v590_v42 = vunpack.c.l.s8.bf16 %v354_v37 }
 0x125   :  { %739 = vmatpush1.bf16.msra.mxu0 %v556_v38  ;;  %903 = vmatpush1.bf16.msra.mxu1 %v558_v47  ;;  %v592_v38 = vunpack.c.h.s8.bf16 %v352_v35  ;;  %v594_v47 = vunpack.c.h.s8.bf16 %v354_v37 }
 0x126   :  { %740 = vmatprep.subr.bf16.mxu0 %v561_v48  ;;  %904 = vmatprep.subr.bf16.mxu1 %v563_v49  ;;  %v597_v48 = vunpack.c.l.s8.bf16 %v357_v45  ;;  %v599_v49 = vunpack.c.l.s8.bf16 %v359_v46 }
 0x129   :  { %741 = vmatpush1.bf16.msra.mxu0 %v560_v54  ;;  %905 = vmatpush1.bf16.msra.mxu1 %v562_v55  ;;  %v601_v54 = vunpack.c.h.s8.bf16 %v357_v45  ;;  %v603_v55 = vunpack.c.h.s8.bf16 %v359_v46 }
 0x12a   :  { %751 = vmatprep.subr.bf16.mxu0 %v565_v39  ;;  %915 = vmatprep.subr.bf16.mxu1 %v567_v56  ;;  %v361_v39 = vld [vmem:[#allocation9 + $0x3a8] sm:$0xff]  ;;  %v363_v56 = vld [vmem:[#allocation9 + $0x3b8] sm:$0xff] }
 0x12b   :  { %v605_v59 = vunpack.c.l.s8.bf16 %v361_v39  ;;  %v609_v1 = vunpack.c.h.s8.bf16 %v361_v39  ;;  %v611_v2 = vunpack.c.h.s8.bf16 %v363_v56  ;;  %v1029_v39 = vld [vmem:[#allocation11 + $0x68] sm:$0xff] }
 0x12c   :  { %743 = vmatmul.mubr.bf16.vlgmr.msra.gmra.mrb[0].mxu0 %v240_v60  ;;  %907 = vmatmul.mubr.bf16.vlgmr.msra.gmra.mrb[0].mxu1 %v240_v60  ;;  %v607_v60 = vunpack.c.l.s8.bf16 %v363_v56 }
 0x12d   :  { %752 = vmatpush1.bf16.msra.mxu0 %v564_v61  ;;  %916 = vmatpush1.bf16.msra.mxu1 %v566_v62  ;;  %v360_v61 = vld [vmem:[#allocation9 + $0x3a0] sm:$0xff]  ;;  %v362_v62 = vld [vmem:[#allocation9 + $0x3b0] sm:$0xff] }
 0x12e   :  { %753 = vmatprep.subr.bf16.mxu0 %v569_v63  ;;  %917 = vmatprep.subr.bf16.mxu1 %v571_v0  ;;  %v604_v63 = vunpack.c.l.s8.bf16 %v360_v61  ;;  %v606_v0 = vunpack.c.l.s8.bf16 %v362_v62 }
 0x12f   :  { %783 = vmatprep.mubr.bf16.mxu0 %v243_v3  ;;  %947 = vmatprep.mubr.bf16.mxu1 %v243_v3  ;;  %v365_v3 = vld [vmem:[#allocation9 + $0x3c8] sm:$0xff] }
 0x130   :  { %v613_v8 = vunpack.c.l.s8.bf16 %v365_v3 }
 0x131   :  { %754 = vmatpush1.bf16.msra.mxu0 %v568_v4  ;;  %918 = vmatpush1.bf16.msra.mxu1 %v570_v5  ;;  %v367_v4 = vld [vmem:[#allocation9 + $0x3d8] sm:$0xff]  ;;  %v148_v5 = vsub.s32 6, %v1586_v36 }
 0x132   :  { %755 = vmatprep.subr.bf16.mxu0 %v573_v6  ;;  %919 = vmatprep.subr.bf16.mxu1 %v575_v7  ;;  %v608_v6 = vunpack.c.h.s8.bf16 %v360_v61  ;;  %v610_v7 = vunpack.c.h.s8.bf16 %v362_v62  ;;  %v615_v9 = vunpack.c.l.s8.bf16 %v367_v4  ;;  %v1025_v61 = vld [vmem:[#allocation11 + $0x48] sm:$0xff] }
 0x135   :  { %756 = vmatpush1.bf16.msra.mxu0 %v572_v10  ;;  %920 = vmatpush1.bf16.msra.mxu1 %v574_v11  ;;  %v364_v10 = vld [vmem:[#allocation9 + $0x3c0] sm:$0xff]  ;;  %v366_v11 = vld [vmem:[#allocation9 + $0x3d0] sm:$0xff] }
 0x136   :  { %757 = vmatprep.subr.bf16.mxu0 %v577_v12  ;;  %921 = vmatprep.subr.bf16.mxu1 %v579_v13  ;;  %v1294_v12 = vld [vmem:[#allocation8] sm:$0xff]  ;;  %v612_v15 = vunpack.c.l.s8.bf16 %v364_v10  ;;  %v614_v16 = vunpack.c.l.s8.bf16 %v366_v11 }
 0x137   :  { %v149_v13 = vrot.slane %v1294_v12, %v148_v5 }
 0x139   :  { %758 = vmatpush1.bf16.msra.mxu0 %v576_v17  ;;  %922 = vmatpush1.bf16.msra.mxu1 %v578_v18  ;;  %v118_v17 = vld [vmem:[#allocation2 + $0x30] sm:$0xff]  ;;  %v617_v18 = vunpack.c.h.s8.bf16 %v365_v3  ;;  %v1030_v3 = vld [vmem:[#allocation11 + $0x70] sm:$0xff] }
 0x13a   :  { %759 = vmatprep.subr.bf16.mxu0 %v581_v19  ;;  %923 = vmatprep.subr.bf16.mxu1 %v583_v21  ;;  %v619_v19 = vunpack.c.h.s8.bf16 %v367_v4  ;;  %v369_v21 = vld [vmem:[#allocation9 + $0x3e8] sm:$0xff]  ;;  %v168_v23 = vmul.f32 %v149_v13, %v118_v17  ;;  %v1061_v13 = vunpack.c.h.s8.bf16 %v1030_v3  ;;  %v1023_v17 = vld [vmem:[#allocation11 + $0x38] sm:$0xff] }
 0x13b   :  { %v621_v29 = vunpack.c.l.s8.bf16 %v369_v21  ;;  %v625_v37 = vunpack.c.h.s8.bf16 %v369_v21 }
 0x13d   :  { %760 = vmatpush1.bf16.msra.mxu0 %v580_v24  ;;  %924 = vmatpush1.bf16.msra.mxu1 %v582_v25  ;;  %v1295_v24 = vld [vmem:[#allocation6] sm:$0xff] }
 0x13e   :  { %761 = vmatprep.subr.bf16.mxu0 %v585_v26  ;;  %925 = vmatprep.subr.bf16.mxu1 %v587_v28  ;;  %v199_v25 = vrot.slane %v1295_v24, %v148_v5  ;;  %v616_v26 = vunpack.c.h.s8.bf16 %v364_v10  ;;  %v618_v28 = vunpack.c.h.s8.bf16 %v366_v11  ;;  %v1051_v5 = vunpack.c.h.s8.bf16 %v1025_v61 }
 0x141   :  { %762 = vmatpush1.bf16.msra.mxu0 %v584_v31  ;;  %926 = vmatpush1.bf16.msra.mxu1 %v586_v32  ;;  %v368_v31 = vld [vmem:[#allocation9 + $0x3e0] sm:$0xff]  ;;  %v370_v32 = vld [vmem:[#allocation9 + $0x3f0] sm:$0xff] }
 0x142   :  { %763 = vmatprep.subr.bf16.mxu0 %v589_v33  ;;  %927 = vmatprep.subr.bf16.mxu1 %v591_v34  ;;  %v218_v33 = vadd.f32 %v199_v25, %v168_v23  ;;  %v620_v34 = vunpack.c.l.s8.bf16 %v368_v31  ;;  %v622_v35 = vunpack.c.l.s8.bf16 %v370_v32  ;;  %v624_v45 = vunpack.c.h.s8.bf16 %v368_v31  ;;  %v1027_v23 = vld [vmem:[#allocation11 + $0x58] sm:$0xff]  ;;  %v956_v31 = vld [vmem:[%s1667_s4] sm:$0xf] }
 0x143   :  { %v626_v46 = vunpack.c.h.s8.bf16 %v370_v32  ;;  %v1054_v25 = vunpack.c.l.s8.bf16 %v1027_v23  ;;  %v982_v32 = vld [vmem:[%s1668_s5] sm:$0xf] }
 0x145   :  { %764 = vmatpush1.bf16.msra.mxu0 %v588_v41  ;;  %928 = vmatpush1.bf16.msra.mxu1 %v590_v42  ;;  %v627_v41 = vunpack.c.h.s8.bf16 %v371_v22  ;;  %v1020_v42 = vld [vmem:[#allocation11 + $0x20] sm:$0xff]  ;;  %v1019_v22 = vld [vmem:[#allocation11 + $0x18] sm:$0xff] }
 0x146   :  { %765 = vmatprep.subr.bf16.mxu0 %v593_v43  ;;  %929 = vmatprep.subr.bf16.mxu1 %v595_v44  ;;  %v1028_v43 = vld [vmem:[#allocation11 + $0x60] sm:$0xff]  ;;  %v1208_v44 = vclamps-f32 %v218_v33, 5.0  ;;  %v1038_v24 = vunpack.c.l.s8.bf16 %v1019_v22  ;;  %v961_v33 = vrot.slane %v956_v31, %v1600_v20 }
 0x148   :  { %v242_v50 = vpack.c.bf16 %v1208_v44, %v1208_v44 }
 0x149   :  { %766 = vmatpush1.bf16.msra.mxu0 %v592_v38  ;;  %930 = vmatpush1.bf16.msra.mxu1 %v594_v47  ;;  %v1040_v38 = vunpack.c.l.s8.bf16 %v1020_v42  ;;  %v1056_v47 = vunpack.c.l.s8.bf16 %v1028_v43 }
 0x14a   :  { %767 = vmatprep.subr.bf16.mxu0 %v597_v48  ;;  %931 = vmatprep.subr.bf16.mxu1 %v599_v49  ;;  %v1016_v48 = vld [vmem:[#allocation11] sm:$0xff] }
 0x14b   :  { %v1024_v49 = vld [vmem:[#allocation11 + $0x40] sm:$0xff]  ;;  %v1032_v51 = vunpack.c.l.s8.bf16 %v1016_v48  ;;  %v1033_v56 = vunpack.c.h.s8.bf16 %v1016_v48 }
 0x14d   :  { %768 = vmatpush1.bf16.msra.mxu0 %v596_v52  ;;  %932 = vmatpush1.bf16.msra.mxu1 %v598_v53  ;;  %v1048_v52 = vunpack.c.l.s8.bf16 %v1024_v49  ;;  %v1041_v53 = vunpack.c.h.s8.bf16 %v1020_v42  ;;  %v995_v42 = vrot.slane %v982_v32, %v1614_v14 }
 0x14e   :  { %769 = vmatprep.subr.bf16.mxu0 %v601_v54  ;;  %933 = vmatprep.subr.bf16.mxu1 %v603_v55  ;;  %v1057_v54 = vunpack.c.h.s8.bf16 %v1028_v43  ;;  %v1021_v55 = vld [vmem:[#allocation11 + $0x28] sm:$0xff] }
 0x151   :  { %770 = vmatpush1.bf16.msra.mxu0 %v600_v57  ;;  %934 = vmatpush1.bf16.msra.mxu1 %v602_v58  ;;  %v1049_v57 = vunpack.c.h.s8.bf16 %v1024_v49  ;;  %v1042_v58 = vunpack.c.l.s8.bf16 %v1021_v55 }
 0x152   :  { %771 = vmatprep.subr.bf16.mxu0 %v605_v59  ;;  %935 = vmatprep.subr.bf16.mxu1 %v607_v60  ;;  %v1058_v59 = vunpack.c.l.s8.bf16 %v1029_v39  ;;  %v1017_v60 = vld [vmem:[#allocation11 + $0x8] sm:$0xff] }
 0x153   :  { %v1034_v62 = vunpack.c.l.s8.bf16 %v1017_v60  ;;  %v1035_v4 = vunpack.c.h.s8.bf16 %v1017_v60 }
 0x155   :  { %772 = vmatpush1.bf16.msra.mxu0 %v604_v63  ;;  %936 = vmatpush1.bf16.msra.mxu1 %v606_v0  ;;  %v1050_v63 = vunpack.c.l.s8.bf16 %v1025_v61  ;;  %v1043_v0 = vunpack.c.h.s8.bf16 %v1021_v55 }
 0x156   :  { %773 = vmatprep.subr.bf16.mxu0 %v609_v1  ;;  %937 = vmatprep.subr.bf16.mxu1 %v611_v2  ;;  %v1059_v1 = vunpack.c.h.s8.bf16 %v1029_v39  ;;  %v1022_v2 = vld [vmem:[#allocation11 + $0x30] sm:$0xff] }
 0x157   :  { %v1045_v12 = vunpack.c.h.s8.bf16 %v1022_v2 }
 0x159   :  { %774 = vmatpush1.bf16.msra.mxu0 %v608_v6  ;;  %938 = vmatpush1.bf16.msra.mxu1 %v610_v7  ;;  %v1044_v6 = vunpack.c.l.s8.bf16 %v1022_v2  ;;  %v1060_v7 = vunpack.c.l.s8.bf16 %v1030_v3 }
 0x15a   :  { %775 = vmatprep.subr.bf16.mxu0 %v613_v8  ;;  %939 = vmatprep.subr.bf16.mxu1 %v615_v9  ;;  %v1018_v8 = vld [vmem:[#allocation11 + $0x10] sm:$0xff] }
 0x15b   :  { %v1026_v9 = vld [vmem:[#allocation11 + $0x50] sm:$0xff]  ;;  %v1036_v10 = vunpack.c.l.s8.bf16 %v1018_v8 }
 0x15c   :  { %v1052_v11 = vunpack.c.l.s8.bf16 %v1026_v9 }
 0x15d   :  { %776 = vmatpush1.bf16.msra.mxu0 %v612_v15  ;;  %940 = vmatpush1.bf16.msra.mxu1 %v614_v16  ;;  %v1037_v15 = vunpack.c.h.s8.bf16 %v1018_v8  ;;  %v1053_v16 = vunpack.c.h.s8.bf16 %v1026_v9  ;;  %v1210_v9 = vld [vmem:[%s1670_s7] ss:$0 sm:$0xff]  ;;  %s1176_s7 = sld [smem:[#allocation12]] }
 0x15e   :  { %777 = vmatprep.subr.bf16.mxu0 %v617_v18  ;;  %941 = vmatprep.subr.bf16.mxu1 %v619_v19  ;;  %v1031_v18 = vld [vmem:[#allocation11 + $0x78] sm:$0xff]  ;;  %v1046_v19 = vunpack.c.l.s8.bf16 %v1023_v17 }
 0x15f   :  { %v1062_v21 = vunpack.c.l.s8.bf16 %v1031_v18 }
 0x161   :  { %778 = vmatpush1.bf16.msra.mxu0 %v616_v26  ;;  %942 = vmatpush1.bf16.msra.mxu1 %v618_v28  ;;  %v1047_v26 = vunpack.c.h.s8.bf16 %v1023_v17  ;;  %v1063_v28 = vunpack.c.h.s8.bf16 %v1031_v18 }
 0x162   :  { %779 = vmatprep.subr.bf16.mxu0 %v621_v29  ;;  %943 = vmatprep.subr.bf16.mxu1 %v623_v30  ;;  %v1039_v29 = vunpack.c.h.s8.bf16 %v1019_v22  ;;  %v1055_v30 = vunpack.c.h.s8.bf16 %v1027_v23 }
 0x165   :  { %780 = vmatpush1.bf16.msra.mxu0 %v620_v34  ;;  %944 = vmatpush1.bf16.msra.mxu1 %v622_v35  ;;  %v969_v34 = vrot.slane %v956_v31, %v1614_v14  ;;  %v965_v35 = vrot.slane %v956_v31, %v1593_v40 }
 0x166   :  { %781 = vmatprep.subr.bf16.mxu0 %v625_v37  ;;  %945 = vmatprep.subr.bf16.mxu1 %v627_v41  ;;  %v973_v37 = vrot.slane %v956_v31, %v1603_v27  ;;  %v987_v41 = vrot.slane %v982_v32, %v1600_v20 }
 0x169   :  { %782 = vmatpush1.bf16.msra.mxu0 %v624_v45  ;;  %946 = vmatpush1.bf16.msra.mxu1 %v626_v46  ;;  %v991_v45 = vrot.slane %v982_v32, %v1593_v40  ;;  %v999_v46 = vrot.slane %v982_v32, %v1603_v27 }
 0x16a   :  { %1213 = vmatprep.subr.bf16.mxu0 %v1040_v38  ;;  %1235 = vmatprep.subr.bf16.mxu1 %v1056_v47 }
 0x16c   :  { %784 = vmatmul.mubr.bf16.vlgmr.msra.gmra.mrb[0].mxu0 %v242_v50  ;;  %948 = vmatmul.mubr.bf16.vlgmr.msra.gmra.mrb[0].mxu1 %v242_v50 }
 0x16d   :  { %1214 = vmatpush3.bf16.msra.mxu0 %v1032_v51  ;;  %1236 = vmatpush3.bf16.msra.mxu1 %v1048_v52 }
 0x16e   :  { %1215 = vmatprep.subr.bf16.mxu0 %v1041_v53  ;;  %1237 = vmatprep.subr.bf16.mxu1 %v1057_v54 }
 0x171   :  { %1216 = vmatpush3.bf16.msra.mxu0 %v1033_v56  ;;  %1238 = vmatpush3.bf16.msra.mxu1 %v1049_v57 }
 0x172   :  { %1217 = vmatprep.subr.bf16.mxu0 %v1042_v58  ;;  %1239 = vmatprep.subr.bf16.mxu1 %v1058_v59 }
 0x175   :  { %1218 = vmatpush3.bf16.msra.mxu0 %v1034_v62  ;;  %1240 = vmatpush3.bf16.msra.mxu1 %v1050_v63 }
 0x176   :  { %1219 = vmatprep.subr.bf16.mxu0 %v1043_v0  ;;  %1241 = vmatprep.subr.bf16.mxu1 %v1059_v1 }
 0x179   :  { %1220 = vmatpush3.bf16.msra.mxu0 %v1035_v4  ;;  %1242 = vmatpush3.bf16.msra.mxu1 %v1051_v5 }
 0x17a   :  { %1221 = vmatprep.subr.bf16.mxu0 %v1044_v6  ;;  %1243 = vmatprep.subr.bf16.mxu1 %v1060_v7 }
 0x17d   :  { %1222 = vmatpush3.bf16.msra.mxu0 %v1036_v10  ;;  %1244 = vmatpush3.bf16.msra.mxu1 %v1052_v11  ;;  %v1211_v11 = vld [vmem:[%s1671_s8] ss:$0 sm:$0xff]  ;;  %s1460_s8 = smov [#allocation13]  }
 0x17e   :  { %1223 = vmatprep.subr.bf16.mxu0 %v1045_v12  ;;  %1245 = vmatprep.subr.bf16.mxu1 %v1061_v13  ;;  %s1190_s21 = sshll.u32 %s1460_s8, 4  ;;  %s1191_s21 = int_to_ptr.vmem [resolvable:$true] %s1190_s21 }
 0x17f   :  { %s1418_s23 = scalar_lea.vmem %s1191_s21, 16  ;;  %s1422_s24 = scalar_lea.vmem %s1191_s21, 32 }
 0x180   :  { %p1419_p3 = scmp.ne.s32.totalorder %s1191_s21, %s1418_s23  ;;  %p1423_p4 = scmp.lt.s32.totalorder %s1191_s21, %s1191_s21 }
 0x181   :  { %1224 = vmatpush3.bf16.msra.mxu0 %v1037_v15  ;;  %1246 = vmatpush3.bf16.msra.mxu1 %v1053_v16  ;;  %p1424_p5 = scmp.lt.s32.totalorder %s1422_s24, %s1418_s23 }
 0x182   :  { %1225 = vmatprep.subr.bf16.mxu0 %v1046_v19  ;;  %1247 = vmatprep.subr.bf16.mxu1 %v1062_v21 }
 0x183   :  { %p1425_p6 = por %p1424_p5, %p1423_p4 }
 0x185   :  { %1226 = vmatpush3.bf16.msra.mxu0 %v1038_v24  ;;  %1248 = vmatpush3.bf16.msra.mxu1 %v1054_v25  ;;  %p1426_p7 = pnand %p1425_p6, %p1419_p3 }
 0x186   :  { %1227 = vmatprep.subr.bf16.mxu0 %v1047_v26  ;;  %1249 = vmatprep.subr.bf16.mxu1 %v1063_v28  ;;  %v1177_v26 = vstv %s1176_s7 }
 0x189   :  { %1228 = vmatpush3.bf16.msra.mxu0 %v1039_v29  ;;  %1250 = vmatpush3.bf16.msra.mxu1 %v1055_v30  ;;  %v1180_v29 = vstv %s1212_s19 }
 0x23f   :  { %v785_v43 = vpop.f32.mrb[0].mxu0  ;;  %v949_v44 = vpop.f32.mrb[0].mxu1 }
 0x240   :  { %v978_v38 = vmul.f32 %v961_v33, %v785_v43  ;;  %v980_v47 = vmul.f32 %v969_v34, %v949_v44  ;;  %v787_v48 = vpop.f32.mrb[1].mxu0  ;;  %v951_v49 = vpop.f32.mrb[1].mxu1 }
 0x241   :  { %v979_v50 = vmul.f32 %v965_v35, %v787_v48  ;;  %v981_v51 = vmul.f32 %v973_v37, %v951_v49  ;;  %v789_v52 = vpop.f32.mrb[2].mxu0  ;;  %v953_v53 = vpop.f32.mrb[2].mxu1 }
 0x242   :  { %v1004_v54 = vadd.f32 %v987_v41, %v978_v38  ;;  %v1006_v55 = vadd.f32 %v995_v42, %v980_v47  ;;  %v790_v39 = vpop.f32.mrb[3].mxu0  ;;  %v954_v20 = vpop.f32.mrb[3].mxu1 }
 0x243   :  { %v1005_v56 = vadd.f32 %v991_v45, %v979_v50  ;;  %v1007_v14 = vadd.f32 %v999_v46, %v981_v51 }
 0x244   :  { %v1008_v57 = vmax.f32 %v1004_v54, 0.0  ;;  %v1010_v58 = vmax.f32 %v1006_v55, 0.0 }
 0x245   :  { %v1009_v59 = vmax.f32 %v1005_v56, 0.0  ;;  %v1011_v40 = vmax.f32 %v1007_v14, 0.0 }
 0x246   :  { %v1012_v61 = vpack.c.bf16 %v1008_v57, %v1008_v57  ;;  %v1014_v62 = vpack.c.bf16 %v1010_v58, %v1010_v58 }
 0x247   :  { %v1013_v60 = vpack.c.bf16 %v1009_v59, %v1009_v59  ;;  %v1015_v27 = vpack.c.bf16 %v1011_v40, %v1011_v40 }
 0x249   :  { %1096 = vmatprep.mubr.bf16.mxu0 %v1013_v60  ;;  %1136 = vmatprep.mubr.bf16.mxu1 %v1015_v27 }
 0x24a   :  { %1097 = vmatmul.mubr.bf16.vlgmr.msra.gmra.mrb[4].mxu0 %v1012_v61  ;;  %1137 = vmatmul.mubr.bf16.vlgmr.msra.gmra.mrb[4].mxu1 %v1014_v62 }
 0x31d   :  { %v1229_v63 = vpop.f32.mrb[4].mxu0  ;;  %v1251_v0 = vpop.f32.mrb[4].mxu1 }
 0x31e   :  { %v1230_v1 = vpop.f32.mrb[5].mxu0  ;;  %v1252_v2 = vpop.f32.mrb[5].mxu1 }
 0x31f   :  { %v1231_v3 = vadd.f32 %v1230_v1, %v1229_v63  ;;  %v1253_v4 = vadd.f32 %v1252_v2, %v1251_v0  ;;  %v1232_v5 = vpop.f32.mrb[6].mxu0  ;;  %v1254_v6 = vpop.f32.mrb[6].mxu1 }
 0x320   :  { %v1233_v7 = vpop.f32.mrb[7].mxu0  ;;  %v1255_v8 = vpop.f32.mrb[7].mxu1 }
 0x321   :  { %v1139_v10 = vadd.f32 %v1253_v4, %v1231_v3 }
 0x323   :  { %v1151_v12 = vmul.f32 %v1210_v9, %v1139_v10 }
 0x325   :  { %v1159_v13 = vadd.f32 %v1211_v11, %v1151_v12 }
 0x327   :  { %v1160_v15 = vmul.f32 %v1159_v13, %v1159_v13 }
 0x329   :  { %v1164_v16 = vsel %vm1163_vm0, %v1160_v15, 0.0 }
 0x32a   :  { %1165 = vadd.xlane.f32.xlu0 %v1164_v16 }
 0x3b7   :  { %v1166_v17 = vpop.xlane.xlu0 %1165 }
 0x3b8   :  { %v1167_v18 = vrot.slane %v1166_v17, 4 }
 0x3ba   :  { %v1168_v19 = vadd.f32 %v1167_v18, %v1166_v17 }
 0x3bc   :  { %v1169_v21 = vrot.slane %v1168_v19, 2 }
 0x3be   :  { %v1170_v22 = vadd.f32 %v1169_v21, %v1168_v19 }
 0x3c0   :  { %v1171_v23 = vrot.slane %v1170_v22, 1 }
 0x3c2   :  { %v1172_v24 = vadd.f32 %v1171_v23, %v1170_v22 }
 0x3c4   :  { %1281 = vpush %v1172_v24 }
 0x3f5   :  { %s1282_s20 = spop %1281 }
 0x3f6   :  { %v1174_v25 = vstv %s1282_s20 }
 0x3f7   :  { %v1175_v28 = vmul.f32 0.00390625, %v1174_v25 }
 0x3f9   :  { %v1178_v36 = vmul.f32 %v1177_v26, %v1175_v28 }
 0x3fb   :  { %v1181_v30 = vadd.f32 %v1180_v29, %v1178_v36 }
 0x3fd   :  { %1183 = vst.msk [vmem:[#allocation13] sm:$0x1] %vm1182_vm1, %v1181_v30 }
 0x3fe   :  { %1429 = shalt.err (!%p1426_p7)
}
 0x3ff   :  { %s1430_s27 = scalar_lea.hbm %s1673_s10, 16 }
 0x400   :  { %p1431_p8 = scmp.ne.s32.totalorder %s1673_s10, %s1430_s27  ;;  %p1434_p9 = scmp.lt.u32.totalorder %s1430_s27, %s1673_s10 }
 0x402   :  { %p1436_p10 = pnand %p1434_p9, %p1431_p8 }
 0x404   :  { %1439 = shalt.err (!%p1436_p10)
}
 0x405   :  { %1193 = dma.vmem_to_hbm [thread:$0]  %s1191_s21, 16, %s1673_s10, [#allocation4]  }
 0x406   :  { %1448 = dma.done.wait [#allocation4], 16  }
 0x407   :  { %1449 = vsyncadd [#allocation4], 4294967280 }
 0x408   :  { %1197 = vsyncpa [#allocation3], 1 }
 0x409   :  { %1198 = vsyncpa [#allocation7], 1 }
 0x40a   :  { %1199 = vsyncpa [#allocation10], 1 }
 0x40b   :  { %1200 = vsyncpa [#allocation4], 1 }
 0x40c   :  { %1201 = vsyncpa [#allocation5], 1 }

</bundles_post_ra>
